<compile_context>
chip_gen: v7x
topology: tpu7x:2x2x1
jax: 0.10.0
libtpu: 0.0.40
codegen_flags: <defaults>
</compile_context>

<pallas_src>
import functools
import math

import jax
import jax.numpy as jnp
from jax import lax
from jax.experimental import pallas as pl
from jax.experimental.pallas import tpu as pltpu

EPS = 1e-5
_UNROLL_SAMPLES = 32   # per-sample loop is unrolled up to this many samples/block


# ------------------------------ Pallas kernel ------------------------------ #

def rsbu_cw_kernel(x_ref, cin_ref, cout_ref, w1_ref, w2_ref, f1w_ref, f2w_ref,
                   mask_ref, o_ref, y_scr, *, length, cpi, bt, conv_dtype):
    f32 = jnp.float32
    x = x_ref[...].astype(f32)                          # (Cpi, M), M = Bt*L
    m = x.shape[1]
    cpo = o_ref.shape[0]

    # packed per-channel constants (folded inference-mode BatchNorms + biases)
    bn1_s, bn1_h = cin_ref[:, 0:1], cin_ref[:, 1:2]
    c1_b  = cout_ref[:, 0:1]
    bn2_s = cout_ref[:, 1:2]
    bn2_h = cout_ref[:, 2:3]
    c2_b  = cout_ref[:, 3:4]
    f1_b  = cout_ref[:, 4:5]
    bnf_s = cout_ref[:, 5:6]
    bnf_h = cout_ref[:, 6:7]
    f2_b  = cout_ref[:, 7:8]

    m_prev = mask_ref[0:1, :]                 # conv dtype, 1 where x[l-1] is in-sample
    m_next = mask_ref[1:2, :]                 # conv dtype, 1 where x[l+1] is in-sample

    def conv3(y, w_ref):
        # 3-tap "same" conv. Taps kept as 3 small matmuls (no (3C, M) concat
        # slab): at small C the kernel is load/store bound, not MXU bound.
        yc = y.astype(conv_dtype)
        y_prev = pltpu.roll(yc, shift=1, axis=1) * m_prev        # y[:, l-1], 0 at seq start
        y_next = pltpu.roll(yc, shift=m - 1, axis=1) * m_next    # y[:, l+1], 0 at seq end
        acc = jnp.dot(w_ref[1], yc, preferred_element_type=f32)
        acc = acc + jnp.dot(w_ref[0], y_prev, preferred_element_type=f32)
        acc = acc + jnp.dot(w_ref[2], y_next, preferred_element_type=f32)
        return acc

    # BRC: BN -> ReLU -> Conv1 -> BN -> ReLU -> Conv2
    y = jnp.maximum(x * bn1_s + bn1_h, 0.0)
    y = conv3(y, w1_ref) + c1_b                         # (Cpo, M) f32
    y = jnp.maximum(y * bn2_s + bn2_h, 0.0)
    y = conv3(y, w2_ref) + c2_b                         # (Cpo, M) f32
    y_scr[...] = y                                      # stage for per-sample slicing

    f1w = f1w_ref[...]
    f2w = f2w_ref[...]
    inv_l = 1.0 / float(length)

    def per_sample(b):
        start = b * length
        if not isinstance(b, int):
            start = pl.multiple_of(start, length)
        sl = pl.ds(start, length)
        yb = y_scr[:, sl]                                             # (Cpo, L) f32
        # per-sample GAP: mean(|y|) over the length axis (XLU lane reduction)
        gap = jnp.sum(jnp.abs(yb), axis=1, keepdims=True) * inv_l     # (Cpo, 1)
        # tiny per-sample FC (Linear -> BN -> ReLU -> Linear -> Sigmoid)
        h = jnp.dot(f1w, gap, preferred_element_type=f32) + f1_b
        h = jnp.maximum(h * bnf_s + bnf_h, 0.0)
        z = jnp.dot(f2w, h, preferred_element_type=f32) + f2_b
        thr = gap * jax.nn.sigmoid(z)                                 # (Cpo, 1), >= 0
        # soft threshold: sign(y)*max(|y|-thr, 0) == y - clip(y, -thr, thr)
        shr = yb - jnp.clip(yb, -thr, thr)
        xb = x_ref[:, sl].astype(f32)                                 # residual (Cpi, L)
        # each output row range written exactly once; padded input channels are
        # zero so the slice-add reproduces PyTorch's zero-padded concat exactly.
        o_ref[0:cpi, sl] = (shr[0:cpi, :] + xb).astype(o_ref.dtype)
        if cpo > cpi:
            o_ref[cpi:cpo, sl] = shr[cpi:cpo, :].astype(o_ref.dtype)

    if bt <= _UNROLL_SAMPLES:
        for b in range(bt):                 # unrolled: small fixed trip count
            per_sample(b)
    else:
        @pl.loop(0, bt)                     # fallback for large Bt (e.g. odd L)
        def _(b):
            per_sample(b)


# ------------------------------ JAX wrapper -------------------------------- #

def _round_up(v, mult):
    return (v + mult - 1) // mult * mult


def _choose_block(n, length, cpi, cpo, conv_bytes, block_samples=None,
                  budget=10 * 1024 * 1024, max_samples=_UNROLL_SAMPLES):
    # Bt is a multiple of bt0 so every block's lane extent (Bt*L) is a multiple
    # of 128: lane-dense output stores and legal lane tiling for multi-step grids.
    bt0 = 128 // math.gcd(length, 128)

    def blk_bytes(bt):
        m = bt * length
        f32_slabs = 2 * cpi + 2 * cpo + cpo + 3 * cpo   # pipelined x/out, y scratch, temps
        conv_slabs = 3 * cpi + 3 * cpo                  # rolled taps in conv dtype
        return m * (4 * f32_slabs + conv_bytes * conv_slabs)

    if block_samples is not None:
        bt = _round_up(max(1, int(block_samples)), bt0)
    else:
        cap = max(bt0, (max_samples // bt0) * bt0)
        cap = min(cap, _round_up(n, bt0))
        if n >= 2 * bt0:
            # keep >= 2 grid steps: DMA/compute overlap + both v7x TensorCores busy
            cap = min(cap, max(bt0, (n // (2 * bt0)) * bt0))
        bt = bt0
        while bt + bt0 <= cap and blk_bytes(bt + bt0) <= budget:
            bt += bt0
    n_pad = _round_up(max(n, bt), bt)
    return bt, n_pad


def rsbu_cw_forward(x, params, *, down_sample=False, block_samples=None,
                    conv_dtype=jnp.bfloat16):
    # TODO(synk): down_sample=True (stride-2 conv + AvgPool1d shortcut) not implemented.
    assert not down_sample, "down_sample=True path not implemented in the Pallas kernel"
    n, c_in, length = x.shape
    w1, w2 = params["conv1_w"], params["conv2_w"]
    c_out, _, k = w1.shape
    assert k == 3, "kernel assumes kernel_size=3 ('same' conv with padding=1)"
    assert c_out in (c_in, 2 * c_in), "shortcut zero-padding assumes C_out in {C_in, 2*C_in}"

    cpi, cpo = _round_up(c_in, 8), _round_up(c_out, 8)

    # fold inference-mode BatchNorm into per-channel scale/shift
    def bn_fold(g, b, mean, var):
        s = g / jnp.sqrt(var + EPS)
        return s, b - mean * s

    bn1_s, bn1_h = bn_fold(params["bn1_g"], params["bn1_b"], params["bn1_m"], params["bn1_v"])
    bn2_s, bn2_h = bn_fold(params["bn2_g"], params["bn2_b"], params["bn2_m"], params["bn2_v"])
    bnf_s, bnf_h = bn_fold(params["bnf_g"], params["bnf_b"], params["bnf_m"], params["bnf_v"])

    def padv(v, c):
        return jnp.pad(v, (0, c - v.shape[0]))

    cc_in = jnp.stack([padv(bn1_s, cpi), padv(bn1_h, cpi)], axis=1)            # (Cpi, 2)
    cc_out = jnp.stack([padv(params["conv1_b"], cpo), padv(bn2_s, cpo), padv(bn2_h, cpo),
                        padv(params["conv2_b"], cpo), padv(params["fc1_b"], cpo),
                        padv(bnf_s, cpo), padv(bnf_h, cpo), padv(params["fc2_b"], cpo)],
                       axis=1)                                                  # (Cpo, 8)

    def pack_conv(w, rows, cols):
        co, ci, kk = w.shape
        wt = jnp.transpose(w, (2, 0, 1))                                        # (K, co, ci)
        wp = jnp.zeros((kk, rows, cols), jnp.float32).at[:, :co, :ci].set(wt)
        return wp.astype(conv_dtype)

    w1_f = pack_conv(w1, cpo, cpi)                                              # (3, Cpo, Cpi)
    w2_f = pack_conv(w2, cpo, cpo)                                              # (3, Cpo, Cpo)

    def pad_mat(w, rows, cols):
        return jnp.zeros((rows, cols), jnp.float32).at[:w.shape[0], :w.shape[1]].set(w)

    f1w = pad_mat(params["fc1_w"], cpo, cpo)
    f2w = pad_mat(params["fc2_w"], cpo, cpo)

    conv_bytes = jnp.dtype(conv_dtype).itemsize
    bt, n_pad = _choose_block(n, length, cpi, cpo, conv_bytes, block_samples)
    m = bt * length
    grid = n_pad // bt

    # lane-dense (channels, batch*length) slab
    xt = jnp.transpose(x, (1, 0, 2))                                            # (C_in, N, L)
    xt = jnp.pad(xt, ((0, cpi - c_in), (0, n_pad - n), (0, 0)))
    x2 = xt.reshape(cpi, n_pad * length)

    pos = jnp.arange(m, dtype=jnp.int32) % length
    masks = jnp.stack([pos != 0, pos != length - 1]).astype(conv_dtype)         # (2, M)

    kernel = functools.partial(rsbu_cw_kernel, length=length, cpi=cpi, bt=bt,
                               conv_dtype=conv_dtype)

    def const_spec(shape):
        return pl.BlockSpec(shape, lambda *_: (0,) * len(shape))

    grid_spec = pltpu.PrefetchScalarGridSpec(
        num_scalar_prefetch=0,
        grid=(grid,),
        in_specs=[
            pl.BlockSpec((cpi, m), lambda i: (0, i)),              # activation slab
            const_spec((cpi, 2)), const_spec((cpo, 8)),            # per-channel constants
            const_spec((3, cpo, cpi)), const_spec((3, cpo, cpo)),  # packed conv taps
            const_spec((cpo, cpo)), const_spec((cpo, cpo)),        # fc weights
            const_spec((2, m)),                                    # conv boundary masks
        ],
        out_specs=pl.BlockSpec((cpo, m), lambda i: (0, i)),
        scratch_shapes=[pltpu.VMEM((cpo, m), jnp.float32)],        # staged conv output
    )

    out2 = pl.pallas_call(
        kernel,
        out_shape=jax.ShapeDtypeStruct((cpo, n_pad * length), x.dtype),
        grid_spec=grid_spec,
        compiler_params=pltpu.CompilerParams(
            dimension_semantics=("parallel",),
            vmem_limit_bytes=48 * 1024 * 1024,
        ),
    )(x2, cc_in, cc_out, w1_f, w2_f, f1w, f2w, masks)

    out = jnp.transpose(out2.reshape(cpo, n_pad, length), (1, 0, 2))
    return out[:n, :c_out, :]


# ---------------------------- pure-JAX reference ---------------------------- #

def ref_forward(x, params):
    def bn(v, g, b, m, var):
        return (g[None, :, None] * (v - m[None, :, None])
                / jnp.sqrt(var[None, :, None] + EPS) + b[None, :, None])

    def conv(v, w, b):
        y = lax.conv_general_dilated(v, w, (1,), [(1, 1)],
                                     dimension_numbers=("NCH", "OIH", "NCH"))
        return y + b[None, :, None]

    y = jax.nn.relu(bn(x, params["bn1_g"], params["bn1_b"], params["bn1_m"], params["bn1_v"]))
    y = conv(y, params["conv1_w"], params["conv1_b"])
    y = jax.nn.relu(bn(y, params["bn2_g"], params["bn2_b"], params["bn2_m"], params["bn2_v"]))
    y = conv(y, params["conv2_w"], params["conv2_b"])

    y_abs = jnp.abs(y)
    gap = jnp.mean(y_abs, axis=2)                                            # (N, Cout)
    h = gap @ params["fc1_w"].T + params["fc1_b"]
    h = jax.nn.relu(params["bnf_g"] * (h - params["bnf_m"])
                    / jnp.sqrt(params["bnf_v"] + EPS) + params["bnf_b"])
    alpha = jax.nn.sigmoid(h @ params["fc2_w"].T + params["fc2_b"])
    thr = (gap * alpha)[:, :, None]
    shrunk = jnp.sign(y) * jnp.maximum(y_abs - thr, 0.0)

    shortcut = x
    if x.shape[1] != y.shape[1]:
        shortcut = jnp.concatenate([shortcut, jnp.zeros_like(shortcut)], axis=1)
    return shrunk + shortcut


# -------------------------------- param init -------------------------------- #

def init_params(key, c_in, c_out, k):
    ks = iter(jax.random.split(key, 20))

    def u(shape, scale=0.5):
        return jax.random.uniform(next(ks), shape, jnp.float32, -scale, scale)

    return dict(
        bn1_g=1.0 + u((c_in,), 0.1), bn1_b=u((c_in,), 0.1),
        bn1_m=u((c_in,), 0.1), bn1_v=1.0 + u((c_in,), 0.1),
        conv1_w=u((c_out, c_in, k)), conv1_b=u((c_out,), 0.1),
        bn2_g=1.0 + u((c_out,), 0.1), bn2_b=u((c_out,), 0.1),
        bn2_m=u((c_out,), 0.1), bn2_v=1.0 + u((c_out,), 0.1),
        conv2_w=u((c_out, c_out, k)), conv2_b=u((c_out,), 0.1),
        fc1_w=u((c_out, c_out)), fc1_b=u((c_out,), 0.1),
        bnf_g=1.0 + u((c_out,), 0.1), bnf_b=u((c_out,), 0.1),
        bnf_m=u((c_out,), 0.1), bnf_v=1.0 + u((c_out,), 0.1),
        fc2_w=u((c_out, c_out)), fc2_b=u((c_out,), 0.1),
    )


if __name__ == "__main__":
    key = jax.random.PRNGKey(0)

    def run_case(case_key, n, c_in, c_out, length, block_samples=None,
                 conv_dtype=jnp.bfloat16, tol=1e-1):
        kx, kp = jax.random.split(case_key)
        x = jax.random.normal(kx, (n, c_in, length), jnp.float32)
        params = init_params(kp, c_in, c_out, 3)
        out = jax.block_until_ready(
            rsbu_cw_forward(x, params, block_samples=block_samples,
                            conv_dtype=conv_dtype))
        ref = ref_forward(x, params)
        assert out.shape == (n, c_out, length)
        max_err = float(jnp.max(jnp.abs(out - ref)))
        assert max_err < tol, f"mismatch vs reference: {max_err}"

    k1, k2, k3, k4 = jax.random.split(key, 4)
    # exact f32-conv path (tight tolerance)
    run_case(k1, 2, 4, 4, 16, conv_dtype=jnp.float32, tol=2e-4)     # C_in == C_out
    run_case(k2, 3, 8, 16, 16, conv_dtype=jnp.float32, tol=2e-4)    # channel expansion
    run_case(k3, 4, 4, 4, 64, block_samples=2,
             conv_dtype=jnp.float32, tol=2e-4)                      # multi-step grid
    # default bf16-conv path (bf16-native MXU on v6e/v7x), multi-step grid
    run_case(k4, 8, 4, 8, 128, tol=1e-1)

    print("KERNEL_OK")
</pallas_src>

<mosaic_0001>
module attributes {stable_mosaic.version = 11 : i64} {
  func.func @rsbu_cw_kernel(%arg0: i32, %arg1: memref<8x128xf32, #tpu.memory_space<vmem>>, %arg2: memref<8x2xf32, #tpu.memory_space<vmem>>, %arg3: memref<8x8xf32, #tpu.memory_space<vmem>>, %arg4: memref<3x8x8xf32, #tpu.memory_space<vmem>>, %arg5: memref<3x8x8xf32, #tpu.memory_space<vmem>>, %arg6: memref<8x8xf32, #tpu.memory_space<vmem>>, %arg7: memref<8x8xf32, #tpu.memory_space<vmem>>, %arg8: memref<2x128xf32, #tpu.memory_space<vmem>>, %arg9: memref<8x128xf32, #tpu.memory_space<vmem>>, %arg10: memref<8x128xf32, #tpu.memory_space<vmem>>) attributes {dimension_semantics = [#tpu.dimension_semantics<parallel>], iteration_bounds = array<i64: 1>, scalar_prefetch = 0 : i64, scratch_operands = 1 : i64, tpu.core_type = #tpu.core_type<tc>, window_params = [{transform_indices = @transform_0, window_bounds = array<i64: 8, 128>}, {pipeline_mode = #tpu.pipeline_mode<synchronous>, transform_indices = @transform_1, window_bounds = array<i64: 8, 2>}, {pipeline_mode = #tpu.pipeline_mode<synchronous>, transform_indices = @transform_2, window_bounds = array<i64: 8, 8>}, {pipeline_mode = #tpu.pipeline_mode<synchronous>, transform_indices = @transform_3, window_bounds = array<i64: 3, 8, 8>}, {pipeline_mode = #tpu.pipeline_mode<synchronous>, transform_indices = @transform_4, window_bounds = array<i64: 3, 8, 8>}, {pipeline_mode = #tpu.pipeline_mode<synchronous>, transform_indices = @transform_5, window_bounds = array<i64: 8, 8>}, {pipeline_mode = #tpu.pipeline_mode<synchronous>, transform_indices = @transform_6, window_bounds = array<i64: 8, 8>}, {pipeline_mode = #tpu.pipeline_mode<synchronous>, transform_indices = @transform_7, window_bounds = array<i64: 2, 128>}, {transform_indices = @transform_8, window_bounds = array<i64: 8, 128>}]} {
    %c0 = arith.constant 0 : index
    %c0_0 = arith.constant 0 : index
    %0 = vector.load %arg1[%c0, %c0_0] : memref<8x128xf32, #tpu.memory_space<vmem>>, vector<8x128xf32>
    %c0_1 = arith.constant 0 : index
    %c0_2 = arith.constant 0 : index
    %1 = vector.load %arg2[%c0_1, %c0_2] : memref<8x2xf32, #tpu.memory_space<vmem>>, vector<8x1xf32>
    %c0_3 = arith.constant 0 : index
    %c1 = arith.constant 1 : index
    %2 = vector.load %arg2[%c0_3, %c1] : memref<8x2xf32, #tpu.memory_space<vmem>>, vector<8x1xf32>
    %c0_4 = arith.constant 0 : index
    %c0_5 = arith.constant 0 : index
    %3 = vector.load %arg3[%c0_4, %c0_5] : memref<8x8xf32, #tpu.memory_space<vmem>>, vector<8x1xf32>
    %c0_6 = arith.constant 0 : index
    %c1_7 = arith.constant 1 : index
    %4 = vector.load %arg3[%c0_6, %c1_7] : memref<8x8xf32, #tpu.memory_space<vmem>>, vector<8x1xf32>
    %c0_8 = arith.constant 0 : index
    %c2 = arith.constant 2 : index
    %5 = vector.load %arg3[%c0_8, %c2] : memref<8x8xf32, #tpu.memory_space<vmem>>, vector<8x1xf32>
    %c0_9 = arith.constant 0 : index
    %c3 = arith.constant 3 : index
    %6 = vector.load %arg3[%c0_9, %c3] : memref<8x8xf32, #tpu.memory_space<vmem>>, vector<8x1xf32>
    %c0_10 = arith.constant 0 : index
    %c4 = arith.constant 4 : index
    %7 = vector.load %arg3[%c0_10, %c4] : memref<8x8xf32, #tpu.memory_space<vmem>>, vector<8x1xf32>
    %c0_11 = arith.constant 0 : index
    %c5 = arith.constant 5 : index
    %8 = vector.load %arg3[%c0_11, %c5] : memref<8x8xf32, #tpu.memory_space<vmem>>, vector<8x1xf32>
    %c0_12 = arith.constant 0 : index
    %c6 = arith.constant 6 : index
    %9 = vector.load %arg3[%c0_12, %c6] : memref<8x8xf32, #tpu.memory_space<vmem>>, vector<8x1xf32>
    %c0_13 = arith.constant 0 : index
    %c7 = arith.constant 7 : index
    %10 = vector.load %arg3[%c0_13, %c7] : memref<8x8xf32, #tpu.memory_space<vmem>>, vector<8x1xf32>
    %c0_14 = arith.constant 0 : index
    %c0_15 = arith.constant 0 : index
    %11 = vector.load %arg8[%c0_14, %c0_15] : memref<2x128xf32, #tpu.memory_space<vmem>>, vector<1x128xf32>
    %c1_16 = arith.constant 1 : index
    %c0_17 = arith.constant 0 : index
    %12 = vector.load %arg8[%c1_16, %c0_17] : memref<2x128xf32, #tpu.memory_space<vmem>>, vector<1x128xf32>
    %13 = vector.broadcast %1 : vector<8x1xf32> to vector<8x128xf32>
    %14 = arith.mulf %0, %13 : vector<8x128xf32>
    %15 = vector.broadcast %2 : vector<8x1xf32> to vector<8x128xf32>
    %16 = arith.addf %14, %15 : vector<8x128xf32>
    %cst = arith.constant 0.000000e+00 : f32
    %17 = vector.broadcast %cst : f32 to vector<8x128xf32>
    %18 = arith.maximumf %16, %17 : vector<8x128xf32>
    %c1_i32 = arith.constant 1 : i32
    %19 = tpu.dynamic_rotate %18 by %c1_i32 dim 1 : vector<8x128xf32>, i32 -> vector<8x128xf32>
    %20 = vector.broadcast %11 : vector<1x128xf32> to vector<8x128xf32>
    %21 = arith.mulf %19, %20 : vector<8x128xf32>
    %c127_i32 = arith.constant 127 : i32
    %22 = tpu.dynamic_rotate %18 by %c127_i32 dim 1 : vector<8x128xf32>, i32 -> vector<8x128xf32>
    %23 = vector.broadcast %12 : vector<1x128xf32> to vector<8x128xf32>
    %24 = arith.mulf %22, %23 : vector<8x128xf32>
    %c1_18 = arith.constant 1 : index
    %c0_19 = arith.constant 0 : index
    %c0_20 = arith.constant 0 : index
    %25 = vector.load %arg4[%c1_18, %c0_19, %c0_20] : memref<3x8x8xf32, #tpu.memory_space<vmem>>, vector<1x8x8xf32>
    %26 = vector.shape_cast %25 : vector<1x8x8xf32> to vector<8x8xf32>
    %cst_21 = arith.constant dense<0.000000e+00> : vector<8x128xf32>
    %27 = tpu.matmul %26, %18, %cst_21 {dimension_numbers = #tpu.dot_dimension_numbers<[1], [0], [0], [1], [0, 0, 1, 1], [], []>} : vector<8x8xf32>, vector<8x128xf32>, vector<8x128xf32> -> vector<8x128xf32>
    %c0_22 = arith.constant 0 : index
    %c0_23 = arith.constant 0 : index
    %c0_24 = arith.constant 0 : index
    %28 = vector.load %arg4[%c0_22, %c0_23, %c0_24] : memref<3x8x8xf32, #tpu.memory_space<vmem>>, vector<1x8x8xf32>
    %29 = vector.shape_cast %28 : vector<1x8x8xf32> to vector<8x8xf32>
    %cst_25 = arith.constant dense<0.000000e+00> : vector<8x128xf32>
    %30 = tpu.matmul %29, %21, %cst_25 {dimension_numbers = #tpu.dot_dimension_numbers<[1], [0], [0], [1], [0, 0, 1, 1], [], []>} : vector<8x8xf32>, vector<8x128xf32>, vector<8x128xf32> -> vector<8x128xf32>
    %31 = arith.addf %27, %30 : vector<8x128xf32>
    %c2_26 = arith.constant 2 : index
    %c0_27 = arith.constant 0 : index
    %c0_28 = arith.constant 0 : index
    %32 = vector.load %arg4[%c2_26, %c0_27, %c0_28] : memref<3x8x8xf32, #tpu.memory_space<vmem>>, vector<1x8x8xf32>
    %33 = vector.shape_cast %32 : vector<1x8x8xf32> to vector<8x8xf32>
    %cst_29 = arith.constant dense<0.000000e+00> : vector<8x128xf32>
    %34 = tpu.matmul %33, %24, %cst_29 {dimension_numbers = #tpu.dot_dimension_numbers<[1], [0], [0], [1], [0, 0, 1, 1], [], []>} : vector<8x8xf32>, vector<8x128xf32>, vector<8x128xf32> -> vector<8x128xf32>
    %35 = arith.addf %31, %34 : vector<8x128xf32>
    %36 = vector.broadcast %3 : vector<8x1xf32> to vector<8x128xf32>
    %37 = arith.addf %35, %36 : vector<8x128xf32>
    %38 = vector.broadcast %4 : vector<8x1xf32> to vector<8x128xf32>
    %39 = arith.mulf %37, %38 : vector<8x128xf32>
    %40 = vector.broadcast %5 : vector<8x1xf32> to vector<8x128xf32>
    %41 = arith.addf %39, %40 : vector<8x128xf32>
    %cst_30 = arith.constant 0.000000e+00 : f32
    %42 = vector.broadcast %cst_30 : f32 to vector<8x128xf32>
    %43 = arith.maximumf %41, %42 : vector<8x128xf32>
    %c1_i32_31 = arith.constant 1 : i32
    %44 = tpu.dynamic_rotate %43 by %c1_i32_31 dim 1 : vector<8x128xf32>, i32 -> vector<8x128xf32>
    %45 = vector.broadcast %11 : vector<1x128xf32> to vector<8x128xf32>
    %46 = arith.mulf %44, %45 : vector<8x128xf32>
    %c127_i32_32 = arith.constant 127 : i32
    %47 = tpu.dynamic_rotate %43 by %c127_i32_32 dim 1 : vector<8x128xf32>, i32 -> vector<8x128xf32>
    %48 = vector.broadcast %12 : vector<1x128xf32> to vector<8x128xf32>
    %49 = arith.mulf %47, %48 : vector<8x128xf32>
    %c1_33 = arith.constant 1 : index
    %c0_34 = arith.constant 0 : index
    %c0_35 = arith.constant 0 : index
    %50 = vector.load %arg5[%c1_33, %c0_34, %c0_35] : memref<3x8x8xf32, #tpu.memory_space<vmem>>, vector<1x8x8xf32>
    %51 = vector.shape_cast %50 : vector<1x8x8xf32> to vector<8x8xf32>
    %cst_36 = arith.constant dense<0.000000e+00> : vector<8x128xf32>
    %52 = tpu.matmul %51, %43, %cst_36 {dimension_numbers = #tpu.dot_dimension_numbers<[1], [0], [0], [1], [0, 0, 1, 1], [], []>} : vector<8x8xf32>, vector<8x128xf32>, vector<8x128xf32> -> vector<8x128xf32>
    %c0_37 = arith.constant 0 : index
    %c0_38 = arith.constant 0 : index
    %c0_39 = arith.constant 0 : index
    %53 = vector.load %arg5[%c0_37, %c0_38, %c0_39] : memref<3x8x8xf32, #tpu.memory_space<vmem>>, vector<1x8x8xf32>
    %54 = vector.shape_cast %53 : vector<1x8x8xf32> to vector<8x8xf32>
    %cst_40 = arith.constant dense<0.000000e+00> : vector<8x128xf32>
    %55 = tpu.matmul %54, %46, %cst_40 {dimension_numbers = #tpu.dot_dimension_numbers<[1], [0], [0], [1], [0, 0, 1, 1], [], []>} : vector<8x8xf32>, vector<8x128xf32>, vector<8x128xf32> -> vector<8x128xf32>
    %56 = arith.addf %52, %55 : vector<8x128xf32>
    %c2_41 = arith.constant 2 : index
    %c0_42 = arith.constant 0 : index
    %c0_43 = arith.constant 0 : index
    %57 = vector.load %arg5[%c2_41, %c0_42, %c0_43] : memref<3x8x8xf32, #tpu.memory_space<vmem>>, vector<1x8x8xf32>
    %58 = vector.shape_cast %57 : vector<1x8x8xf32> to vector<8x8xf32>
    %cst_44 = arith.constant dense<0.000000e+00> : vector<8x128xf32>
    %59 = tpu.matmul %58, %49, %cst_44 {dimension_numbers = #tpu.dot_dimension_numbers<[1], [0], [0], [1], [0, 0, 1, 1], [], []>} : vector<8x8xf32>, vector<8x128xf32>, vector<8x128xf32> -> vector<8x128xf32>
    %60 = arith.addf %56, %59 : vector<8x128xf32>
    %61 = vector.broadcast %6 : vector<8x1xf32> to vector<8x128xf32>
    %62 = arith.addf %60, %61 : vector<8x128xf32>
    %c0_45 = arith.constant 0 : index
    %c0_46 = arith.constant 0 : index
    %63 = vector.load %arg10[%c0_45, %c0_46] : memref<8x128xf32, #tpu.memory_space<vmem>>, vector<8x128xf32>
    tpu.vector_store %arg10[%c0_45, %c0_46], %62 {strides = array<i32>} : memref<8x128xf32, #tpu.memory_space<vmem>>, vector<8x128xf32>,
    %c0_47 = arith.constant 0 : index
    %c0_48 = arith.constant 0 : index
    %64 = vector.load %arg6[%c0_47, %c0_48] : memref<8x8xf32, #tpu.memory_space<vmem>>, vector<8x8xf32>
    %c0_49 = arith.constant 0 : index
    %c0_50 = arith.constant 0 : index
    %65 = vector.load %arg7[%c0_49, %c0_50] : memref<8x8xf32, #tpu.memory_space<vmem>>, vector<8x8xf32>
    %c0_51 = arith.constant 0 : index
    %c0_52 = arith.constant 0 : index
    %66 = vector.load %arg10[%c0_51, %c0_52] : memref<8x128xf32, #tpu.memory_space<vmem>>, vector<8x16xf32>
    %67 = math.absf %66 : vector<8x16xf32>
    %cst_53 = arith.constant dense<0.000000e+00> : vector<8xf32>
    %68 = vector.multi_reduction <add>, %67, %cst_53 [1] : vector<8x16xf32> to vector<8xf32>
    %69 = vector.shape_cast %68 : vector<8xf32> to vector<8x1xf32>
    %cst_54 = arith.constant 6.250000e-02 : f32
    %70 = vector.broadcast %cst_54 : f32 to vector<8x1xf32>
    %71 = arith.mulf %69, %70 : vector<8x1xf32>
    %cst_55 = arith.constant dense<0.000000e+00> : vector<8x1xf32>
    %72 = tpu.matmul %64, %71, %cst_55 {dimension_numbers = #tpu.dot_dimension_numbers<[1], [0], [0], [1], [0, 0, 1, 1], [], []>} : vector<8x8xf32>, vector<8x1xf32>, vector<8x1xf32> -> vector<8x1xf32>
    %73 = arith.addf %72, %7 : vector<8x1xf32>
    %74 = arith.mulf %73, %8 : vector<8x1xf32>
    %75 = arith.addf %74, %9 : vector<8x1xf32>
    %cst_56 = arith.constant 0.000000e+00 : f32
    %76 = vector.broadcast %cst_56 : f32 to vector<8x1xf32>
    %77 = arith.maximumf %75, %76 : vector<8x1xf32>
    %cst_57 = arith.constant dense<0.000000e+00> : vector<8x1xf32>
    %78 = tpu.matmul %65, %77, %cst_57 {dimension_numbers = #tpu.dot_dimension_numbers<[1], [0], [0], [1], [0, 0, 1, 1], [], []>} : vector<8x8xf32>, vector<8x1xf32>, vector<8x1xf32> -> vector<8x1xf32>
    %79 = arith.addf %78, %10 : vector<8x1xf32>
    %80 = arith.negf %79 : vector<8x1xf32>
    %81 = math.exp %80 : vector<8x1xf32>
    %cst_58 = arith.constant 1.000000e+00 : f32
    %82 = vector.broadcast %cst_58 : f32 to vector<8x1xf32>
    %83 = arith.addf %82, %81 : vector<8x1xf32>
    %84 = arith.divf %82, %83 : vector<8x1xf32>
    %85 = arith.mulf %71, %84 : vector<8x1xf32>
    %cst_59 = arith.constant 0.000000e+00 : f32
    %86 = vector.broadcast %cst_59 : f32 to vector<8x1xf32>
    %87 = arith.subf %86, %85 : vector<8x1xf32>
    %88 = vector.broadcast %87 : vector<8x1xf32> to vector<8x16xf32>
    %89 = arith.maximumf %88, %66 : vector<8x16xf32>
    %90 = vector.broadcast %85 : vector<8x1xf32> to vector<8x16xf32>
    %91 = arith.minimumf %90, %89 : vector<8x16xf32>
    %92 = arith.subf %66, %91 : vector<8x16xf32>
    %c0_60 = arith.constant 0 : index
    %c0_61 = arith.constant 0 : index
    %93 = vector.load %arg1[%c0_60, %c0_61] : memref<8x128xf32, #tpu.memory_space<vmem>>, vector<8x16xf32>
    %94 = arith.addf %92, %93 : vector<8x16xf32>
    %c0_62 = arith.constant 0 : index
    %c0_63 = arith.constant 0 : index
    %95 = vector.load %arg9[%c0_62, %c0_63] : memref<8x128xf32, #tpu.memory_space<vmem>>, vector<8x16xf32>
    tpu.vector_store %arg9[%c0_62, %c0_63], %94 {strides = array<i32>} : memref<8x128xf32, #tpu.memory_space<vmem>>, vector<8x16xf32>,
    %c0_64 = arith.constant 0 : index
    %c16 = arith.constant 16 : index
    %96 = vector.load %arg10[%c0_64, %c16] : memref<8x128xf32, #tpu.memory_space<vmem>>, vector<8x16xf32>
    %97 = math.absf %96 : vector<8x16xf32>
    %cst_65 = arith.constant dense<0.000000e+00> : vector<8xf32>
    %98 = vector.multi_reduction <add>, %97, %cst_65 [1] : vector<8x16xf32> to vector<8xf32>
    %99 = vector.shape_cast %98 : vector<8xf32> to vector<8x1xf32>
    %cst_66 = arith.constant 6.250000e-02 : f32
    %100 = vector.broadcast %cst_66 : f32 to vector<8x1xf32>
    %101 = arith.mulf %99, %100 : vector<8x1xf32>
    %cst_67 = arith.constant dense<0.000000e+00> : vector<8x1xf32>
    %102 = tpu.matmul %64, %101, %cst_67 {dimension_numbers = #tpu.dot_dimension_numbers<[1], [0], [0], [1], [0, 0, 1, 1], [], []>} : vector<8x8xf32>, vector<8x1xf32>, vector<8x1xf32> -> vector<8x1xf32>
    %103 = arith.addf %102, %7 : vector<8x1xf32>
    %104 = arith.mulf %103, %8 : vector<8x1xf32>
    %105 = arith.addf %104, %9 : vector<8x1xf32>
    %cst_68 = arith.constant 0.000000e+00 : f32
    %106 = vector.broadcast %cst_68 : f32 to vector<8x1xf32>
    %107 = arith.maximumf %105, %106 : vector<8x1xf32>
    %cst_69 = arith.constant dense<0.000000e+00> : vector<8x1xf32>
    %108 = tpu.matmul %65, %107, %cst_69 {dimension_numbers = #tpu.dot_dimension_numbers<[1], [0], [0], [1], [0, 0, 1, 1], [], []>} : vector<8x8xf32>, vector<8x1xf32>, vector<8x1xf32> -> vector<8x1xf32>
    %109 = arith.addf %108, %10 : vector<8x1xf32>
    %110 = arith.negf %109 : vector<8x1xf32>
    %111 = math.exp %110 : vector<8x1xf32>
    %cst_70 = arith.constant 1.000000e+00 : f32
    %112 = vector.broadcast %cst_70 : f32 to vector<8x1xf32>
    %113 = arith.addf %112, %111 : vector<8x1xf32>
    %114 = arith.divf %112, %113 : vector<8x1xf32>
    %115 = arith.mulf %101, %114 : vector<8x1xf32>
    %cst_71 = arith.constant 0.000000e+00 : f32
    %116 = vector.broadcast %cst_71 : f32 to vector<8x1xf32>
    %117 = arith.subf %116, %115 : vector<8x1xf32>
    %118 = vector.broadcast %117 : vector<8x1xf32> to vector<8x16xf32>
    %119 = arith.maximumf %118, %96 : vector<8x16xf32>
    %120 = vector.broadcast %115 : vector<8x1xf32> to vector<8x16xf32>
    %121 = arith.minimumf %120, %119 : vector<8x16xf32>
    %122 = arith.subf %96, %121 : vector<8x16xf32>
    %c0_72 = arith.constant 0 : index
    %c16_73 = arith.constant 16 : index
    %123 = vector.load %arg1[%c0_72, %c16_73] : memref<8x128xf32, #tpu.memory_space<vmem>>, vector<8x16xf32>
    %124 = arith.addf %122, %123 : vector<8x16xf32>
    %c0_74 = arith.constant 0 : index
    %c16_75 = arith.constant 16 : index
    %125 = vector.load %arg9[%c0_74, %c16_75] : memref<8x128xf32, #tpu.memory_space<vmem>>, vector<8x16xf32>
    tpu.vector_store %arg9[%c0_74, %c16_75], %124 {strides = array<i32>} : memref<8x128xf32, #tpu.memory_space<vmem>>, vector<8x16xf32>,
    %c0_76 = arith.constant 0 : index
    %c32 = arith.constant 32 : index
    %126 = vector.load %arg10[%c0_76, %c32] : memref<8x128xf32, #tpu.memory_space<vmem>>, vector<8x16xf32>
    %127 = math.absf %126 : vector<8x16xf32>
    %cst_77 = arith.constant dense<0.000000e+00> : vector<8xf32>
    %128 = vector.multi_reduction <add>, %127, %cst_77 [1] : vector<8x16xf32> to vector<8xf32>
    %129 = vector.shape_cast %128 : vector<8xf32> to vector<8x1xf32>
    %cst_78 = arith.constant 6.250000e-02 : f32
    %130 = vector.broadcast %cst_78 : f32 to vector<8x1xf32>
    %131 = arith.mulf %129, %130 : vector<8x1xf32>
    %cst_79 = arith.constant dense<0.000000e+00> : vector<8x1xf32>
    %132 = tpu.matmul %64, %131, %cst_79 {dimension_numbers = #tpu.dot_dimension_numbers<[1], [0], [0], [1], [0, 0, 1, 1], [], []>} : vector<8x8xf32>, vector<8x1xf32>, vector<8x1xf32> -> vector<8x1xf32>
    %133 = arith.addf %132, %7 : vector<8x1xf32>
    %134 = arith.mulf %133, %8 : vector<8x1xf32>
    %135 = arith.addf %134, %9 : vector<8x1xf32>
    %cst_80 = arith.constant 0.000000e+00 : f32
    %136 = vector.broadcast %cst_80 : f32 to vector<8x1xf32>
    %137 = arith.maximumf %135, %136 : vector<8x1xf32>
    %cst_81 = arith.constant dense<0.000000e+00> : vector<8x1xf32>
    %138 = tpu.matmul %65, %137, %cst_81 {dimension_numbers = #tpu.dot_dimension_numbers<[1], [0], [0], [1], [0, 0, 1, 1], [], []>} : vector<8x8xf32>, vector<8x1xf32>, vector<8x1xf32> -> vector<8x1xf32>
    %139 = arith.addf %138, %10 : vector<8x1xf32>
    %140 = arith.negf %139 : vector<8x1xf32>
    %141 = math.exp %140 : vector<8x1xf32>
    %cst_82 = arith.constant 1.000000e+00 : f32
    %142 = vector.broadcast %cst_82 : f32 to vector<8x1xf32>
    %143 = arith.addf %142, %141 : vector<8x1xf32>
    %144 = arith.divf %142, %143 : vector<8x1xf32>
    %145 = arith.mulf %131, %144 : vector<8x1xf32>
    %cst_83 = arith.constant 0.000000e+00 : f32
    %146 = vector.broadcast %cst_83 : f32 to vector<8x1xf32>
    %147 = arith.subf %146, %145 : vector<8x1xf32>
    %148 = vector.broadcast %147 : vector<8x1xf32> to vector<8x16xf32>
    %149 = arith.maximumf %148, %126 : vector<8x16xf32>
    %150 = vector.broadcast %145 : vector<8x1xf32> to vector<8x16xf32>
    %151 = arith.minimumf %150, %149 : vector<8x16xf32>
    %152 = arith.subf %126, %151 : vector<8x16xf32>
    %c0_84 = arith.constant 0 : index
    %c32_85 = arith.constant 32 : index
    %153 = vector.load %arg1[%c0_84, %c32_85] : memref<8x128xf32, #tpu.memory_space<vmem>>, vector<8x16xf32>
    %154 = arith.addf %152, %153 : vector<8x16xf32>
    %c0_86 = arith.constant 0 : index
    %c32_87 = arith.constant 32 : index
    %155 = vector.load %arg9[%c0_86, %c32_87] : memref<8x128xf32, #tpu.memory_space<vmem>>, vector<8x16xf32>
    tpu.vector_store %arg9[%c0_86, %c32_87], %154 {strides = array<i32>} : memref<8x128xf32, #tpu.memory_space<vmem>>, vector<8x16xf32>,
    %c0_88 = arith.constant 0 : index
    %c48 = arith.constant 48 : index
    %156 = vector.load %arg10[%c0_88, %c48] : memref<8x128xf32, #tpu.memory_space<vmem>>, vector<8x16xf32>
    %157 = math.absf %156 : vector<8x16xf32>
    %cst_89 = arith.constant dense<0.000000e+00> : vector<8xf32>
    %158 = vector.multi_reduction <add>, %157, %cst_89 [1] : vector<8x16xf32> to vector<8xf32>
    %159 = vector.shape_cast %158 : vector<8xf32> to vector<8x1xf32>
    %cst_90 = arith.constant 6.250000e-02 : f32
    %160 = vector.broadcast %cst_90 : f32 to vector<8x1xf32>
    %161 = arith.mulf %159, %160 : vector<8x1xf32>
    %cst_91 = arith.constant dense<0.000000e+00> : vector<8x1xf32>
    %162 = tpu.matmul %64, %161, %cst_91 {dimension_numbers = #tpu.dot_dimension_numbers<[1], [0], [0], [1], [0, 0, 1, 1], [], []>} : vector<8x8xf32>, vector<8x1xf32>, vector<8x1xf32> -> vector<8x1xf32>
    %163 = arith.addf %162, %7 : vector<8x1xf32>
    %164 = arith.mulf %163, %8 : vector<8x1xf32>
    %165 = arith.addf %164, %9 : vector<8x1xf32>
    %cst_92 = arith.constant 0.000000e+00 : f32
    %166 = vector.broadcast %cst_92 : f32 to vector<8x1xf32>
    %167 = arith.maximumf %165, %166 : vector<8x1xf32>
    %cst_93 = arith.constant dense<0.000000e+00> : vector<8x1xf32>
    %168 = tpu.matmul %65, %167, %cst_93 {dimension_numbers = #tpu.dot_dimension_numbers<[1], [0], [0], [1], [0, 0, 1, 1], [], []>} : vector<8x8xf32>, vector<8x1xf32>, vector<8x1xf32> -> vector<8x1xf32>
    %169 = arith.addf %168, %10 : vector<8x1xf32>
    %170 = arith.negf %169 : vector<8x1xf32>
    %171 = math.exp %170 : vector<8x1xf32>
    %cst_94 = arith.constant 1.000000e+00 : f32
    %172 = vector.broadcast %cst_94 : f32 to vector<8x1xf32>
    %173 = arith.addf %172, %171 : vector<8x1xf32>
    %174 = arith.divf %172, %173 : vector<8x1xf32>
    %175 = arith.mulf %161, %174 : vector<8x1xf32>
    %cst_95 = arith.constant 0.000000e+00 : f32
    %176 = vector.broadcast %cst_95 : f32 to vector<8x1xf32>
    %177 = arith.subf %176, %175 : vector<8x1xf32>
    %178 = vector.broadcast %177 : vector<8x1xf32> to vector<8x16xf32>
    %179 = arith.maximumf %178, %156 : vector<8x16xf32>
    %180 = vector.broadcast %175 : vector<8x1xf32> to vector<8x16xf32>
    %181 = arith.minimumf %180, %179 : vector<8x16xf32>
    %182 = arith.subf %156, %181 : vector<8x16xf32>
    %c0_96 = arith.constant 0 : index
    %c48_97 = arith.constant 48 : index
    %183 = vector.load %arg1[%c0_96, %c48_97] : memref<8x128xf32, #tpu.memory_space<vmem>>, vector<8x16xf32>
    %184 = arith.addf %182, %183 : vector<8x16xf32>
    %c0_98 = arith.constant 0 : index
    %c48_99 = arith.constant 48 : index
    %185 = vector.load %arg9[%c0_98, %c48_99] : memref<8x128xf32, #tpu.memory_space<vmem>>, vector<8x16xf32>
    tpu.vector_store %arg9[%c0_98, %c48_99], %184 {strides = array<i32>} : memref<8x128xf32, #tpu.memory_space<vmem>>, vector<8x16xf32>,
    %c0_100 = arith.constant 0 : index
    %c64 = arith.constant 64 : index
    %186 = vector.load %arg10[%c0_100, %c64] : memref<8x128xf32, #tpu.memory_space<vmem>>, vector<8x16xf32>
    %187 = math.absf %186 : vector<8x16xf32>
    %cst_101 = arith.constant dense<0.000000e+00> : vector<8xf32>
    %188 = vector.multi_reduction <add>, %187, %cst_101 [1] : vector<8x16xf32> to vector<8xf32>
    %189 = vector.shape_cast %188 : vector<8xf32> to vector<8x1xf32>
    %cst_102 = arith.constant 6.250000e-02 : f32
    %190 = vector.broadcast %cst_102 : f32 to vector<8x1xf32>
    %191 = arith.mulf %189, %190 : vector<8x1xf32>
    %cst_103 = arith.constant dense<0.000000e+00> : vector<8x1xf32>
    %192 = tpu.matmul %64, %191, %cst_103 {dimension_numbers = #tpu.dot_dimension_numbers<[1], [0], [0], [1], [0, 0, 1, 1], [], []>} : vector<8x8xf32>, vector<8x1xf32>, vector<8x1xf32> -> vector<8x1xf32>
    %193 = arith.addf %192, %7 : vector<8x1xf32>
    %194 = arith.mulf %193, %8 : vector<8x1xf32>
    %195 = arith.addf %194, %9 : vector<8x1xf32>
    %cst_104 = arith.constant 0.000000e+00 : f32
    %196 = vector.broadcast %cst_104 : f32 to vector<8x1xf32>
    %197 = arith.maximumf %195, %196 : vector<8x1xf32>
    %cst_105 = arith.constant dense<0.000000e+00> : vector<8x1xf32>
    %198 = tpu.matmul %65, %197, %cst_105 {dimension_numbers = #tpu.dot_dimension_numbers<[1], [0], [0], [1], [0, 0, 1, 1], [], []>} : vector<8x8xf32>, vector<8x1xf32>, vector<8x1xf32> -> vector<8x1xf32>
    %199 = arith.addf %198, %10 : vector<8x1xf32>
    %200 = arith.negf %199 : vector<8x1xf32>
    %201 = math.exp %200 : vector<8x1xf32>
    %cst_106 = arith.constant 1.000000e+00 : f32
    %202 = vector.broadcast %cst_106 : f32 to vector<8x1xf32>
    %203 = arith.addf %202, %201 : vector<8x1xf32>
    %204 = arith.divf %202, %203 : vector<8x1xf32>
    %205 = arith.mulf %191, %204 : vector<8x1xf32>
    %cst_107 = arith.constant 0.000000e+00 : f32
    %206 = vector.broadcast %cst_107 : f32 to vector<8x1xf32>
    %207 = arith.subf %206, %205 : vector<8x1xf32>
    %208 = vector.broadcast %207 : vector<8x1xf32> to vector<8x16xf32>
    %209 = arith.maximumf %208, %186 : vector<8x16xf32>
    %210 = vector.broadcast %205 : vector<8x1xf32> to vector<8x16xf32>
    %211 = arith.minimumf %210, %209 : vector<8x16xf32>
    %212 = arith.subf %186, %211 : vector<8x16xf32>
    %c0_108 = arith.constant 0 : index
    %c64_109 = arith.constant 64 : index
    %213 = vector.load %arg1[%c0_108, %c64_109] : memref<8x128xf32, #tpu.memory_space<vmem>>, vector<8x16xf32>
    %214 = arith.addf %212, %213 : vector<8x16xf32>
    %c0_110 = arith.constant 0 : index
    %c64_111 = arith.constant 64 : index
    %215 = vector.load %arg9[%c0_110, %c64_111] : memref<8x128xf32, #tpu.memory_space<vmem>>, vector<8x16xf32>
    tpu.vector_store %arg9[%c0_110, %c64_111], %214 {strides = array<i32>} : memref<8x128xf32, #tpu.memory_space<vmem>>, vector<8x16xf32>,
    %c0_112 = arith.constant 0 : index
    %c80 = arith.constant 80 : index
    %216 = vector.load %arg10[%c0_112, %c80] : memref<8x128xf32, #tpu.memory_space<vmem>>, vector<8x16xf32>
    %217 = math.absf %216 : vector<8x16xf32>
    %cst_113 = arith.constant dense<0.000000e+00> : vector<8xf32>
    %218 = vector.multi_reduction <add>, %217, %cst_113 [1] : vector<8x16xf32> to vector<8xf32>
    %219 = vector.shape_cast %218 : vector<8xf32> to vector<8x1xf32>
    %cst_114 = arith.constant 6.250000e-02 : f32
    %220 = vector.broadcast %cst_114 : f32 to vector<8x1xf32>
    %221 = arith.mulf %219, %220 : vector<8x1xf32>
    %cst_115 = arith.constant dense<0.000000e+00> : vector<8x1xf32>
    %222 = tpu.matmul %64, %221, %cst_115 {dimension_numbers = #tpu.dot_dimension_numbers<[1], [0], [0], [1], [0, 0, 1, 1], [], []>} : vector<8x8xf32>, vector<8x1xf32>, vector<8x1xf32> -> vector<8x1xf32>
    %223 = arith.addf %222, %7 : vector<8x1xf32>
    %224 = arith.mulf %223, %8 : vector<8x1xf32>
    %225 = arith.addf %224, %9 : vector<8x1xf32>
    %cst_116 = arith.constant 0.000000e+00 : f32
    %226 = vector.broadcast %cst_116 : f32 to vector<8x1xf32>
    %227 = arith.maximumf %225, %226 : vector<8x1xf32>
    %cst_117 = arith.constant dense<0.000000e+00> : vector<8x1xf32>
    %228 = tpu.matmul %65, %227, %cst_117 {dimension_numbers = #tpu.dot_dimension_numbers<[1], [0], [0], [1], [0, 0, 1, 1], [], []>} : vector<8x8xf32>, vector<8x1xf32>, vector<8x1xf32> -> vector<8x1xf32>
    %229 = arith.addf %228, %10 : vector<8x1xf32>
    %230 = arith.negf %229 : vector<8x1xf32>
    %231 = math.exp %230 : vector<8x1xf32>
    %cst_118 = arith.constant 1.000000e+00 : f32
    %232 = vector.broadcast %cst_118 : f32 to vector<8x1xf32>
    %233 = arith.addf %232, %231 : vector<8x1xf32>
    %234 = arith.divf %232, %233 : vector<8x1xf32>
    %235 = arith.mulf %221, %234 : vector<8x1xf32>
    %cst_119 = arith.constant 0.000000e+00 : f32
    %236 = vector.broadcast %cst_119 : f32 to vector<8x1xf32>
    %237 = arith.subf %236, %235 : vector<8x1xf32>
    %238 = vector.broadcast %237 : vector<8x1xf32> to vector<8x16xf32>
    %239 = arith.maximumf %238, %216 : vector<8x16xf32>
    %240 = vector.broadcast %235 : vector<8x1xf32> to vector<8x16xf32>
    %241 = arith.minimumf %240, %239 : vector<8x16xf32>
    %242 = arith.subf %216, %241 : vector<8x16xf32>
    %c0_120 = arith.constant 0 : index
    %c80_121 = arith.constant 80 : index
    %243 = vector.load %arg1[%c0_120, %c80_121] : memref<8x128xf32, #tpu.memory_space<vmem>>, vector<8x16xf32>
    %244 = arith.addf %242, %243 : vector<8x16xf32>
    %c0_122 = arith.constant 0 : index
    %c80_123 = arith.constant 80 : index
    %245 = vector.load %arg9[%c0_122, %c80_123] : memref<8x128xf32, #tpu.memory_space<vmem>>, vector<8x16xf32>
    tpu.vector_store %arg9[%c0_122, %c80_123], %244 {strides = array<i32>} : memref<8x128xf32, #tpu.memory_space<vmem>>, vector<8x16xf32>,
    %c0_124 = arith.constant 0 : index
    %c96 = arith.constant 96 : index
    %246 = vector.load %arg10[%c0_124, %c96] : memref<8x128xf32, #tpu.memory_space<vmem>>, vector<8x16xf32>
    %247 = math.absf %246 : vector<8x16xf32>
    %cst_125 = arith.constant dense<0.000000e+00> : vector<8xf32>
    %248 = vector.multi_reduction <add>, %247, %cst_125 [1] : vector<8x16xf32> to vector<8xf32>
    %249 = vector.shape_cast %248 : vector<8xf32> to vector<8x1xf32>
    %cst_126 = arith.constant 6.250000e-02 : f32
    %250 = vector.broadcast %cst_126 : f32 to vector<8x1xf32>
    %251 = arith.mulf %249, %250 : vector<8x1xf32>
    %cst_127 = arith.constant dense<0.000000e+00> : vector<8x1xf32>
    %252 = tpu.matmul %64, %251, %cst_127 {dimension_numbers = #tpu.dot_dimension_numbers<[1], [0], [0], [1], [0, 0, 1, 1], [], []>} : vector<8x8xf32>, vector<8x1xf32>, vector<8x1xf32> -> vector<8x1xf32>
    %253 = arith.addf %252, %7 : vector<8x1xf32>
    %254 = arith.mulf %253, %8 : vector<8x1xf32>
    %255 = arith.addf %254, %9 : vector<8x1xf32>
    %cst_128 = arith.constant 0.000000e+00 : f32
    %256 = vector.broadcast %cst_128 : f32 to vector<8x1xf32>
    %257 = arith.maximumf %255, %256 : vector<8x1xf32>
    %cst_129 = arith.constant dense<0.000000e+00> : vector<8x1xf32>
    %258 = tpu.matmul %65, %257, %cst_129 {dimension_numbers = #tpu.dot_dimension_numbers<[1], [0], [0], [1], [0, 0, 1, 1], [], []>} : vector<8x8xf32>, vector<8x1xf32>, vector<8x1xf32> -> vector<8x1xf32>
    %259 = arith.addf %258, %10 : vector<8x1xf32>
    %260 = arith.negf %259 : vector<8x1xf32>
    %261 = math.exp %260 : vector<8x1xf32>
    %cst_130 = arith.constant 1.000000e+00 : f32
    %262 = vector.broadcast %cst_130 : f32 to vector<8x1xf32>
    %263 = arith.addf %262, %261 : vector<8x1xf32>
    %264 = arith.divf %262, %263 : vector<8x1xf32>
    %265 = arith.mulf %251, %264 : vector<8x1xf32>
    %cst_131 = arith.constant 0.000000e+00 : f32
    %266 = vector.broadcast %cst_131 : f32 to vector<8x1xf32>
    %267 = arith.subf %266, %265 : vector<8x1xf32>
    %268 = vector.broadcast %267 : vector<8x1xf32> to vector<8x16xf32>
    %269 = arith.maximumf %268, %246 : vector<8x16xf32>
    %270 = vector.broadcast %265 : vector<8x1xf32> to vector<8x16xf32>
    %271 = arith.minimumf %270, %269 : vector<8x16xf32>
    %272 = arith.subf %246, %271 : vector<8x16xf32>
    %c0_132 = arith.constant 0 : index
    %c96_133 = arith.constant 96 : index
    %273 = vector.load %arg1[%c0_132, %c96_133] : memref<8x128xf32, #tpu.memory_space<vmem>>, vector<8x16xf32>
    %274 = arith.addf %272, %273 : vector<8x16xf32>
    %c0_134 = arith.constant 0 : index
    %c96_135 = arith.constant 96 : index
    %275 = vector.load %arg9[%c0_134, %c96_135] : memref<8x128xf32, #tpu.memory_space<vmem>>, vector<8x16xf32>
    tpu.vector_store %arg9[%c0_134, %c96_135], %274 {strides = array<i32>} : memref<8x128xf32, #tpu.memory_space<vmem>>, vector<8x16xf32>,
    %c0_136 = arith.constant 0 : index
    %c112 = arith.constant 112 : index
    %276 = vector.load %arg10[%c0_136, %c112] : memref<8x128xf32, #tpu.memory_space<vmem>>, vector<8x16xf32>
    %277 = math.absf %276 : vector<8x16xf32>
    %cst_137 = arith.constant dense<0.000000e+00> : vector<8xf32>
    %278 = vector.multi_reduction <add>, %277, %cst_137 [1] : vector<8x16xf32> to vector<8xf32>
    %279 = vector.shape_cast %278 : vector<8xf32> to vector<8x1xf32>
    %cst_138 = arith.constant 6.250000e-02 : f32
    %280 = vector.broadcast %cst_138 : f32 to vector<8x1xf32>
    %281 = arith.mulf %279, %280 : vector<8x1xf32>
    %cst_139 = arith.constant dense<0.000000e+00> : vector<8x1xf32>
    %282 = tpu.matmul %64, %281, %cst_139 {dimension_numbers = #tpu.dot_dimension_numbers<[1], [0], [0], [1], [0, 0, 1, 1], [], []>} : vector<8x8xf32>, vector<8x1xf32>, vector<8x1xf32> -> vector<8x1xf32>
    %283 = arith.addf %282, %7 : vector<8x1xf32>
    %284 = arith.mulf %283, %8 : vector<8x1xf32>
    %285 = arith.addf %284, %9 : vector<8x1xf32>
    %cst_140 = arith.constant 0.000000e+00 : f32
    %286 = vector.broadcast %cst_140 : f32 to vector<8x1xf32>
    %287 = arith.maximumf %285, %286 : vector<8x1xf32>
    %cst_141 = arith.constant dense<0.000000e+00> : vector<8x1xf32>
    %288 = tpu.matmul %65, %287, %cst_141 {dimension_numbers = #tpu.dot_dimension_numbers<[1], [0], [0], [1], [0, 0, 1, 1], [], []>} : vector<8x8xf32>, vector<8x1xf32>, vector<8x1xf32> -> vector<8x1xf32>
    %289 = arith.addf %288, %10 : vector<8x1xf32>
    %290 = arith.negf %289 : vector<8x1xf32>
    %291 = math.exp %290 : vector<8x1xf32>
    %cst_142 = arith.constant 1.000000e+00 : f32
    %292 = vector.broadcast %cst_142 : f32 to vector<8x1xf32>
    %293 = arith.addf %292, %291 : vector<8x1xf32>
    %294 = arith.divf %292, %293 : vector<8x1xf32>
    %295 = arith.mulf %281, %294 : vector<8x1xf32>
    %cst_143 = arith.constant 0.000000e+00 : f32
    %296 = vector.broadcast %cst_143 : f32 to vector<8x1xf32>
    %297 = arith.subf %296, %295 : vector<8x1xf32>
    %298 = vector.broadcast %297 : vector<8x1xf32> to vector<8x16xf32>
    %299 = arith.maximumf %298, %276 : vector<8x16xf32>
    %300 = vector.broadcast %295 : vector<8x1xf32> to vector<8x16xf32>
    %301 = arith.minimumf %300, %299 : vector<8x16xf32>
    %302 = arith.subf %276, %301 : vector<8x16xf32>
    %c0_144 = arith.constant 0 : index
    %c112_145 = arith.constant 112 : index
    %303 = vector.load %arg1[%c0_144, %c112_145] : memref<8x128xf32, #tpu.memory_space<vmem>>, vector<8x16xf32>
    %304 = arith.addf %302, %303 : vector<8x16xf32>
    %c0_146 = arith.constant 0 : index
    %c112_147 = arith.constant 112 : index
    %305 = vector.load %arg9[%c0_146, %c112_147] : memref<8x128xf32, #tpu.memory_space<vmem>>, vector<8x16xf32>
    tpu.vector_store %arg9[%c0_146, %c112_147], %304 {strides = array<i32>} : memref<8x128xf32, #tpu.memory_space<vmem>>, vector<8x16xf32>,
    return
  }
  func.func @transform_0(%arg0: i32) -> (i32, i32) {
    %c0_i32 = arith.constant 0 : i32
    %c0_i32_0 = arith.constant 0 : i32
    return %c0_i32, %arg0 : i32, i32
  }
  func.func @transform_1(%arg0: i32) -> (i32, i32) {
    %c0_i32 = arith.constant 0 : i32
    %c0_i32_0 = arith.constant 0 : i32
    %c0_i32_1 = arith.constant 0 : i32
    return %c0_i32, %c0_i32_0 : i32, i32
  }
  func.func @transform_2(%arg0: i32) -> (i32, i32) {
    %c0_i32 = arith.constant 0 : i32
    %c0_i32_0 = arith.constant 0 : i32
    %c0_i32_1 = arith.constant 0 : i32
    return %c0_i32, %c0_i32_0 : i32, i32
  }
  func.func @transform_3(%arg0: i32) -> (i32, i32, i32) {
    %c0_i32 = arith.constant 0 : i32
    %c0_i32_0 = arith.constant 0 : i32
    %c0_i32_1 = arith.constant 0 : i32
    %c0_i32_2 = arith.constant 0 : i32
    return %c0_i32, %c0_i32_0, %c0_i32_1 : i32, i32, i32
  }
  func.func @transform_4(%arg0: i32) -> (i32, i32, i32) {
    %c0_i32 = arith.constant 0 : i32
    %c0_i32_0 = arith.constant 0 : i32
    %c0_i32_1 = arith.constant 0 : i32
    %c0_i32_2 = arith.constant 0 : i32
    return %c0_i32, %c0_i32_0, %c0_i32_1 : i32, i32, i32
  }
  func.func @transform_5(%arg0: i32) -> (i32, i32) {
    %c0_i32 = arith.constant 0 : i32
    %c0_i32_0 = arith.constant 0 : i32
    %c0_i32_1 = arith.constant 0 : i32
    return %c0_i32, %c0_i32_0 : i32, i32
  }
  func.func @transform_6(%arg0: i32) -> (i32, i32) {
    %c0_i32 = arith.constant 0 : i32
    %c0_i32_0 = arith.constant 0 : i32
    %c0_i32_1 = arith.constant 0 : i32
    return %c0_i32, %c0_i32_0 : i32, i32
  }
  func.func @transform_7(%arg0: i32) -> (i32, i32) {
    %c0_i32 = arith.constant 0 : i32
    %c0_i32_0 = arith.constant 0 : i32
    %c0_i32_1 = arith.constant 0 : i32
    return %c0_i32, %c0_i32_0 : i32, i32
  }
  func.func @transform_8(%arg0: i32) -> (i32, i32) {
    %c0_i32 = arith.constant 0 : i32
    %c0_i32_0 = arith.constant 0 : i32
    return %c0_i32, %arg0 : i32, i32
  }
}

</mosaic_0001>

<bundles_post_ra>
// kernel: tpu_custom_call.1
= control target key start
LH: loop header
LB: loop body
LE: loop exit
PB: predicated region body
PF: predicated region fallthrough
CT: control target
= control target key end

     0   :  { %13 = vsyncpa [#allocation4], 0  ;;  %s2787_s0 = inlined_call_operand.hbm [shape: f32[8,128], index: 0, kind: input, shape index: {}]   ;;  %s2788_s1 = inlined_call_operand.vmem [shape: f32[8,2], index: 1, kind: input, shape index: {}]   ;;  %s2789_s2 = inlined_call_operand.hbm [shape: f32[8,8], index: 2, kind: input, shape index: {}]   ;;  %s2790_s3 = inlined_call_operand.hbm [shape: f32[3,8,8], index: 3, kind: input, shape index: {}]   ;;  %s2791_s4 = inlined_call_operand.vmem [shape: f32[3,8,8], index: 4, kind: input, shape index: {}]   ;;  %s2792_s5 = inlined_call_operand.hbm [shape: f32[8,8], index: 5, kind: input, shape index: {}]   ;;  %s2793_s6 = inlined_call_operand.vmem [shape: f32[8,8], index: 6, kind: input, shape index: {}]   ;;  %s2794_s7 = inlined_call_operand.vmem [shape: f32[2,128], index: 7, kind: input, shape index: {}]   ;;  %s2795_s8 = inlined_call_operand.hbm [shape: f32[8,128], index: 8, kind: output, shape index: {}]  }
   0x1   :  { %14 = vsyncpa [#allocation7], 0 }
   0x2   :  { %15 = vsyncpa [#allocation10], 0 }
   0x3   :  { %16 = vsyncpa [#allocation5], 0  ;;  %s2418_s27 = smov [#allocation6]   ;;  %s2419_s29 = smov [#allocation3]  }
   0x4   :  { %s35_s28 = sshll.u32 %s2418_s27, 4  ;;  %s23_s30 = sshll.u32 %s2419_s29, 4  ;;  %s36_s28 = int_to_ptr.vmem [resolvable:$true] %s35_s28  ;;  %s24_s30 = int_to_ptr.vmem [resolvable:$true] %s23_s30 }
   0x5   :  { %s2300_s11 = scalar_lea.hbm %s2789_s2, 128 }
   0x6   :  { %p2301_p0 = scmp.ne.s32.totalorder %s2789_s2, %s2300_s11  ;;  %p2304_p1 = scmp.lt.u32.totalorder %s2300_s11, %s2789_s2 }
   0x8   :  { %p2306_p2 = pnand %p2304_p1, %p2301_p0 }
   0xa   :  { %2309 = shalt.err (!%p2306_p2)
}
   0xb   :  { %s2310_s16 = scalar_lea.vmem %s36_s28, 128  ;;  %p2315_p4 = scmp.lt.s32.totalorder %s36_s28, %s36_s28 }
   0xc   :  { %p2311_p3 = scmp.ne.s32.totalorder %s36_s28, %s2310_s16  ;;  %p2316_p5 = scmp.lt.s32.totalorder %s2310_s16, %s2310_s16 }
   0xe   :  { %p2317_p6 = por %p2316_p5, %p2315_p4 }
  0x10   :  { %p2318_p7 = pnand %p2317_p6, %p2311_p3 }
  0x12   :  { %2321 = shalt.err (!%p2318_p7)
}
  0x13   :  { %38 = dma.hbm_to_vmem [thread:$0]  %s2789_s2, 128, %s36_s28, [#allocation7]  }
  0x14   :  { %s2322_s21 = scalar_lea.hbm %s2787_s0, 128 }
  0x15   :  { %p2323_p8 = scmp.ne.s32.totalorder %s2787_s0, %s2322_s21  ;;  %p2326_p9 = scmp.lt.u32.totalorder %s2322_s21, %s2787_s0 }
  0x17   :  { %p2328_p10 = pnand %p2326_p9, %p2323_p8 }
  0x19   :  { %2331 = shalt.err (!%p2328_p10)
}
  0x1a   :  { %s2332_s26 = scalar_lea.vmem %s24_s30, 128  ;;  %p2337_p12 = scmp.lt.s32.totalorder %s24_s30, %s24_s30 }
  0x1b   :  { %p2333_p11 = scmp.ne.s32.totalorder %s24_s30, %s2332_s26  ;;  %p2338_p13 = scmp.lt.s32.totalorder %s2332_s26, %s2332_s26 }
  0x1d   :  { %p2339_p0 = por %p2338_p13, %p2337_p12 }
  0x1f   :  { %p2340_p1 = pnand %p2339_p0, %p2333_p11 }
  0x21   :  { %2343 = shalt.err (!%p2340_p1)
}
  0x22   :  { %26 = dma.hbm_to_vmem [thread:$0]  %s2787_s0, 128, %s24_s30, [#allocation4]  }
  0x23   :  { %s2420_s28 = smov [#allocation8]   ;;  %s2344_s11 = scalar_lea.hbm %s2790_s3, 384 }
  0x24   :  { %s44_s29 = sshll.u32 %s2420_s28, 4  ;;  %p2345_p2 = scmp.ne.s32.totalorder %s2790_s3, %s2344_s11  ;;  %s45_s29 = int_to_ptr.vmem [resolvable:$true] %s44_s29 }
  0x25   :  { %p2348_p3 = scmp.lt.u32.totalorder %s2344_s11, %s2790_s3 }
  0x27   :  { %p2350_p4 = pnand %p2348_p3, %p2345_p2 }
  0x29   :  { %2353 = shalt.err (!%p2350_p4)
}
  0x2a   :  { %s2354_s16 = scalar_lea.vmem %s45_s29, 384  ;;  %p2359_p6 = scmp.lt.s32.totalorder %s45_s29, %s45_s29 }
  0x2b   :  { %p2355_p5 = scmp.ne.s32.totalorder %s45_s29, %s2354_s16  ;;  %p2360_p7 = scmp.lt.s32.totalorder %s2354_s16, %s2354_s16 }
  0x2d   :  { %p2361_p8 = por %p2360_p7, %p2359_p6 }
  0x2f   :  { %p2362_p9 = pnand %p2361_p8, %p2355_p5 }
  0x31   :  { %2365 = shalt.err (!%p2362_p9)
}
  0x32   :  { %s2421_s0 = smov 128   ;;  %s2422_s30 = smov 8  }
  0x33   :  { %50 = dma.hbm_to_vmem [thread:$0]  %s2790_s3, 384, %s45_s29, [#allocation7], %s2421_s0, %s2421_s0, %s2422_s30  }
  0x34   :  { %s2423_s19 = smov [#allocation9]   ;;  %s2366_s23 = scalar_lea.hbm %s2792_s5, 128 }
  0x35   :  { %s59_s20 = sshll.u32 %s2423_s19, 4  ;;  %p2367_p10 = scmp.ne.s32.totalorder %s2792_s5, %s2366_s23  ;;  %s60_s20 = int_to_ptr.vmem [resolvable:$true] %s59_s20 }
  0x36   :  { %p2370_p11 = scmp.lt.u32.totalorder %s2366_s23, %s2792_s5 }
  0x38   :  { %p2372_p12 = pnand %p2370_p11, %p2367_p10 }
  0x3a   :  { %2375 = shalt.err (!%p2372_p12)
}
  0x3b   :  { %s2376_s27 = scalar_lea.vmem %s60_s20, 128  ;;  %p2381_p0 = scmp.lt.s32.totalorder %s60_s20, %s60_s20 }
  0x3c   :  { %p2377_p13 = scmp.ne.s32.totalorder %s60_s20, %s2376_s27  ;;  %p2382_p1 = scmp.lt.s32.totalorder %s2376_s27, %s2376_s27 }
  0x3e   :  { %p2383_p2 = por %p2382_p1, %p2381_p0 }
  0x40   :  { %p2384_p3 = pnand %p2383_p2, %p2377_p13 }
  0x42   :  { %2387 = shalt.err (!%p2384_p3)
}
  0x43   :  { %62 = dma.hbm_to_vmem [thread:$0]  %s2792_s5, 128, %s60_s20, [#allocation10]  }
  0x44   :  { %2410 = dma.done.wait [#allocation4], 128  }
  0x45   :  { %2411 = vsyncadd [#allocation4], 4294967168 }
  0x46   :  { %2412 = dma.done.wait [#allocation7], 512  }
  0x47   :  { %2413 = vsyncadd [#allocation7], 4294966784 }
  0x48   :  { %2414 = dma.done.wait [#allocation10], 128  }
  0x49   :  { %2415 = vsyncadd [#allocation10], 4294967168  ;;  %v2424_v0 = vmov 0   ;;  %v80_v1 = vld [vmem:[%s2788_s1] sm:$0xff]  ;;  %v2425_v2 = vmov 1   ;;  %v2542_v3 = vld [vmem:[#allocation6] sm:$0xff] }
  0x4a   :  { %2261 = vset.pattern.permute.xlu0 %v2424_v0  ;;  %2263 = vset.pattern.permute.xlu1 %v2424_v0  ;;  %v2426_v4 = vmov 0.0   ;;  %vm2427_vm0 = vmmov 0   ;;  %v2551_v6 = vld [vmem:[#allocation3] sm:$0xff]  ;;  %vm113_vm1 = vcmask 64512   ;;  %v111_v11 = vld [vmem:[#allocation8 + $0x8] sm:$0xff]  ;;  %s2428_s1 = smov 1  }
  0x4b   :  { %86 = vperm.xlu0 %2261, %v80_v1   ;;  %2130 = vmatprep.subr.mxu1 %v2426_v4  ;;  %s2429_s5 = smov 127   ;;  %v2430_v12 = vmov 2   ;;  %v2047_v13 = vld [vmem:[%s2794_s7] ss:$0 sm:$0xff]  ;;  %v112_v16 = vld [vmem:[#allocation8] sm:$0xff]  ;;  %v2431_v34 = vmov 3  }
  0x4c   :  { %2125 = vmatprep.subr.mxu0 %v2426_v4  ;;  %2127 = vmatprep.mubr.msk.f32.mxu0 %vm2427_vm0, %v2426_v4  ;;  %v2048_v17 = vld [vmem:[%s2794_s7 + $0x1] ss:$0 sm:$0xff]  ;;  %v2052_v37 = vld [vmem:[%s2791_s4 + $0x8] sm:$0xff]  ;;  %v2055_v43 = vld [vmem:[%s2791_s4 + $0x10] sm:$0xff]  ;;  %s2433_s17 = smov 112   ;;  %s2434_s18 = smov 48  }
  0x4d   :  { %2132 = vmatprep.mubr.msk.f32.mxu1 %vm2427_vm0, %v2426_v4  ;;  %v261_v20 = vld [vmem:[#allocation8 + $0x10] sm:$0xff]  ;;  %s2435_s19 = smov 96   ;;  %s2436_s20 = smov 16   ;;  %vm594_vm2 = vcmask 130048   ;;  %vm960_vm3 = vcmask 261248   ;;  %vm1138_vm4 = vcmask 392448  }
  0x4e   :  { %v361_v41 = vld [vmem:[%s2791_s4] sm:$0xff]  ;;  %s2432_s4 = smov 80   ;;  %s2437_s21 = smov 64   ;;  %vm1316_vm5 = vcmask 523648   ;;  %vm1494_vm6 = vcmask 654848   ;;  %vm1672_vm7 = vcmask 786048  }
  0x4f   :  { %2262 = vset.pattern.permute.xlu0 %v2425_v2  ;;  %s2438_s22 = smov 32   ;;  %s2439_s23 = smov 124   ;;  %vm1850_vm8 = vcmask 917248   ;;  %vm2028_vm9 = vcmask 1048448  }
  0x50   :  { %91 = vperm.xlu0 %2262, %v80_v1   ;;  %s2440_s24 = smov 123   ;;  %s2441_s25 = smov 122  }
  0x51   :  { %s2442_s26 = smov 121  }
  0x54   :  { %343 = vperm.xlu0 %2262, %v2542_v3  }
  0x58   :  { %2265 = vset.pattern.permute.xlu0 %v2431_v34 }
  0xca   :  { %v87_v5 = vpop.permute.xlu0 %86 }
  0xcb   :  { %v89_v7 = vmul.f32 %v87_v5, %v2551_v6 }
  0xcf   :  { %v92_v8 = vpop.permute.xlu0 %91 }
  0xd0   :  { %v94_v9 = vadd.f32 %v92_v8, %v89_v7 }
  0xd2   :  { %v95_v10 = vmax.f32 %v94_v9, 0.0 }
  0xd3   :  { %v344_v31 = vpop.permute.xlu0 %343 }
  0xd4   :  { %96 = vrot.lane.b32.xlu1 %v95_v10, %s2428_s1  ;;  %2131 = vmatpush3.msra.mxu1 %v95_v10 }
  0xd5   :  { %2133 = vmatmul.mubr.msk.f32.vlgmr.msra.gmra.mrb[0].mxu1 %vm113_vm1, %v111_v11  ;;  %2140 = vmatprep.subr.mxu1 %v2426_v4  ;;  %v590_v11 = vld [vmem:[#allocation9] sm:$0xff] }
  0xd6   :  { %2142 = vmatprep.mubr.msk.f32.mxu1 %vm2427_vm0, %v2426_v4 }
  0xd8   :  { %103 = vrot.lane.b32.xlu1 %v95_v10, %s2429_s5 }
  0xdc   :  { %338 = vperm.xlu1 %2263, %v2542_v3  }
  0xe0   :  { %2264 = vset.pattern.permute.xlu1 %v2430_v12 }
  0xe1   :  { %348 = vperm.xlu1 %2264, %v2542_v3  }
  0xe5   :  { %2267 = vset.pattern.permute.xlu1 %v2424_v0 }
 0x146   :  { %v97_v14 = vpop.permute.xlu1 %96 }
 0x147   :  { %v102_v15 = vmul.f32 %v2047_v13, %v97_v14 }
 0x149   :  { %2126 = vmatpush3.msra.mxu0 %v102_v15 }
 0x14a   :  { %2128 = vmatmul.mubr.msk.f32.vlgmr.msra.gmra.mrb[0].mxu0 %vm113_vm1, %v112_v16  ;;  %v104_v18 = vpop.permute.xlu1 %103  ;;  %2135 = vmatprep.subr.mxu0 %v2426_v4 }
 0x14b   :  { %v109_v19 = vmul.f32 %v2048_v17, %v104_v18  ;;  %2137 = vmatprep.mubr.msk.f32.mxu0 %vm2427_vm0, %v2426_v4 }
 0x14d   :  { %2136 = vmatpush3.msra.mxu0 %v109_v19 }
 0x14e   :  { %2138 = vmatmul.mubr.msk.f32.vlgmr.msra.gmra.mrb[2].mxu0 %vm113_vm1, %v261_v20  ;;  %2145 = vmatprep.subr.mxu0 %v2426_v4 }
 0x14f   :  { %2147 = vmatprep.mubr.msk.f32.mxu0 %vm2427_vm0, %v2426_v4 }
 0x15b   :  { %v339_v26 = vpop.permute.xlu1 %338 }
 0x160   :  { %v349_v32 = vpop.permute.xlu1 %348 }
 0x1a8   :  { %v256_v21 = vpop.f32.mrb[0].mxu1 }
 0x1a9   :  { %v2134_v22 = vpop.f32.mrb[1].mxu1 }
 0x21d   :  { %v183_v23 = vpop.f32.mrb[0].mxu0 }
 0x21e   :  { %v257_v24 = vadd.f32 %v256_v21, %v183_v23  ;;  %v2129_v25 = vpop.f32.mrb[1].mxu0 }
 0x221   :  { %v331_v27 = vpop.f32.mrb[2].mxu0 }
 0x222   :  { %v335_v28 = vadd.f32 %v331_v27, %v257_v24  ;;  %v2139_v29 = vpop.f32.mrb[3].mxu0 }
 0x224   :  { %v341_v30 = vadd.f32 %v339_v26, %v335_v28 }
 0x226   :  { %v346_v33 = vmul.f32 %v344_v31, %v341_v30 }
 0x228   :  { %v351_v35 = vadd.f32 %v349_v32, %v346_v33 }
 0x22a   :  { %v352_v36 = vmax.f32 %v351_v35, 0.0  ;;  %v2682_v35 = vld [vmem:[%s2793_s6] sm:$0xff]  ;;  %s2443_s6 = smov [#allocation11]  }
 0x22b   :  { %s2036_s3 = sshll.u32 %s2443_s6, 4  ;;  %s2037_s3 = int_to_ptr.vmem [resolvable:$true] %s2036_s3 }
 0x22c   :  { %356 = vrot.lane.b32.xlu1 %v352_v36, %s2429_s5  ;;  %353 = vrot.lane.b32.xlu0 %v352_v36, %s2428_s1  ;;  %s2388_s28 = scalar_lea.vmem %s2037_s3, 128  ;;  %p2393_p5 = scmp.lt.s32.totalorder %s2037_s3, %s2037_s3 }
 0x22d   :  { %2146 = vmatpush3.msra.mxu0 %v352_v36  ;;  %p2389_p4 = scmp.ne.s32.totalorder %s2037_s3, %s2388_s28  ;;  %p2394_p6 = scmp.lt.s32.totalorder %s2388_s28, %s2388_s28 }
 0x22e   :  { %2148 = vmatmul.mubr.msk.f32.vlgmr.msra.gmra.mrb[4].mxu0 %vm113_vm1, %v2052_v37  ;;  %2155 = vmatprep.subr.mxu0 %v2426_v4 }
 0x22f   :  { %2157 = vmatprep.mubr.msk.f32.mxu0 %vm2427_vm0, %v2426_v4  ;;  %p2395_p7 = por %p2394_p6, %p2393_p5 }
 0x230   :  { %585 = vperm.xlu0 %2265, %v2542_v3  }
 0x231   :  { %p2396_p8 = pnand %p2395_p7, %p2389_p4 }
 0x234   :  { %2266 = vset.pattern.permute.xlu0 %v2424_v0 }
 0x29e   :  { %v357_v38 = vpop.permute.xlu1 %356  ;;  %v354_v39 = vpop.permute.xlu0 %353 }
 0x29f   :  { %v355_v40 = vmul.f32 %v2047_v13, %v354_v39  ;;  %v358_v42 = vmul.f32 %v2048_v17, %v357_v38 }
 0x2a1   :  { %2141 = vmatpush3.msra.mxu1 %v355_v40 }
 0x2a2   :  { %2143 = vmatmul.mubr.msk.f32.vlgmr.msra.gmra.mrb[2].mxu1 %vm113_vm1, %v361_v41  ;;  %2150 = vmatprep.subr.mxu1 %v2426_v4 }
 0x2a3   :  { %2151 = vmatpush3.msra.mxu1 %v358_v42  ;;  %2152 = vmatprep.mubr.msk.f32.mxu1 %vm2427_vm0, %v2426_v4 }
 0x2a4   :  { %2160 = vmatprep.subr.mxu1 %v2426_v4 }
 0x2a6   :  { %2153 = vmatmul.mubr.msk.f32.vlgmr.msra.gmra.mrb[4].mxu1 %vm113_vm1, %v2055_v43 }
 0x2a7   :  { %2162 = vmatprep.mubr.msk.f32.mxu1 %vm2427_vm0, %v2426_v4 }
 0x2af   :  { %v586_v50 = vpop.permute.xlu0 %585 }
 0x301   :  { %v504_v44 = vpop.f32.mrb[4].mxu0 }
 0x302   :  { %v2149_v45 = vpop.f32.mrb[5].mxu0 }
 0x375   :  { %v431_v46 = vpop.f32.mrb[2].mxu1 }
 0x376   :  { %v505_v47 = vadd.f32 %v504_v44, %v431_v46  ;;  %v2144_v48 = vpop.f32.mrb[3].mxu1 }
 0x379   :  { %v579_v49 = vpop.f32.mrb[4].mxu1 }
 0x37a   :  { %v583_v51 = vadd.f32 %v579_v49, %v505_v47  ;;  %v2154_v52 = vpop.f32.mrb[5].mxu1 }
 0x37c   :  { %v2602_v53 = vadd.f32 %v586_v50, %v583_v51 }
 0x37e   :  { %v593_v54 = vand.u32 2147483647, %v2602_v53 }
 0x380   :  { %1143 = vrot.lane.b32.xlu0 %v593_v54, %s2432_s4  ;;  %787 = vrot.lane.b32.xlu1 %v593_v54, %s2433_s17  ;;  %v595_v55 = vsel %vm594_vm2, %v593_v54, 0.0 }
 0x384   :  { %1499 = vrot.lane.b32.xlu0 %v593_v54, %s2434_s18  ;;  %965 = vrot.lane.b32.xlu1 %v593_v54, %s2435_s19 }
 0x388   :  { %1855 = vrot.lane.b32.xlu0 %v593_v54, %s2436_s20  ;;  %1321 = vrot.lane.b32.xlu1 %v593_v54, %s2437_s21 }
 0x38c   :  { %1677 = vrot.lane.b32.xlu1 %v593_v54, %s2438_s22 }
 0x3b0   :  { %596 = vadd.xlane.f32.xlu1 %v595_v55 }
 0x3f2   :  { %v1144_v56 = vpop.permute.xlu0 %1143  ;;  %v788_v57 = vpop.permute.xlu1 %787 }
 0x3f3   :  { %v790_v58 = vsel %vm594_vm2, %v788_v57, 0.0  ;;  %v1146_v59 = vsel %vm594_vm2, %v1144_v56, 0.0 }
 0x3f4   :  { %791 = vadd.xlane.f32.xlu0 %v790_v58  ;;  %1147 = vadd.xlane.f32.xlu1 %v1146_v59 }
 0x3f6   :  { %v1500_v60 = vpop.permute.xlu0 %1499  ;;  %v966_v61 = vpop.permute.xlu1 %965 }
 0x3f7   :  { %v968_v62 = vsel %vm594_vm2, %v966_v61, 0.0  ;;  %v1502_v63 = vsel %vm594_vm2, %v1500_v60, 0.0 }
 0x3f8   :  { %969 = vadd.xlane.f32.xlu0 %v968_v62  ;;  %1503 = vadd.xlane.f32.xlu1 %v1502_v63 }
 0x3fa   :  { %v1856_v0 = vpop.permute.xlu0 %1855  ;;  %v1322_v1 = vpop.permute.xlu1 %1321 }
 0x3fb   :  { %v1324_v2 = vsel %vm594_vm2, %v1322_v1, 0.0  ;;  %v1858_v5 = vsel %vm594_vm2, %v1856_v0, 0.0 }
 0x3fc   :  { %1325 = vadd.xlane.f32.xlu0 %v1324_v2  ;;  %1859 = vadd.xlane.f32.xlu1 %v1858_v5 }
 0x3fe   :  { %v1678_v7 = vpop.permute.xlu1 %1677 }
 0x3ff   :  { %v1680_v8 = vsel %vm594_vm2, %v1678_v7, 0.0 }
 0x400   :  { %1681 = vadd.xlane.f32.xlu0 %v1680_v8 }
 0x40d   :  { %675 = vrot.lane.b32.xlu1 %v2542_v3, %s2440_s24 }
 0x411   :  { %679 = vrot.lane.b32.xlu1 %v2542_v3, %s2441_s25 }
 0x416   :  { %599 = vrot.lane.b32.xlu0 %v2542_v3, %s2439_s23 }
 0x41a   :  { %684 = vrot.lane.b32.xlu0 %v2542_v3, %s2442_s26 }
 0x43d   :  { %v597_v9 = vpop.xlane.xlu1 %596 }
 0x43e   :  { %v2616_v10 = vmul.f32 0.0625, %v597_v9 }
 0x440   :  { %2156 = vmatpush3.msra.mxu0 %v2616_v10 }
 0x441   :  { %2158 = vmatmul.mubr.msk.f32.vlgmr.msra.gmra.mrb[6].mxu0 %vm113_vm1, %v590_v11  ;;  %2165 = vmatprep.subr.mxu0 %v2426_v4 }
 0x442   :  { %2167 = vmatprep.mubr.msk.f32.mxu0 %vm2427_vm0, %v2426_v4 }
 0x481   :  { %v792_v12 = vpop.xlane.xlu0 %791  ;;  %v1148_v14 = vpop.xlane.xlu1 %1147 }
 0x482   :  { %v2623_v13 = vmul.f32 0.0625, %v792_v12  ;;  %v2632_v17 = vmul.f32 0.0625, %v1148_v14 }
 0x484   :  { %2166 = vmatpush3.msra.mxu0 %v2623_v13 }
 0x485   :  { %v970_v15 = vpop.xlane.xlu0 %969  ;;  %2168 = vmatmul.mubr.msk.f32.vlgmr.msra.gmra.mrb[8].mxu0 %vm113_vm1, %v590_v11  ;;  %2175 = vmatprep.subr.mxu0 %v2426_v4  ;;  %v1504_v20 = vpop.xlane.xlu1 %1503 }
 0x486   :  { %v2628_v16 = vmul.f32 0.0625, %v970_v15  ;;  %2177 = vmatprep.mubr.msk.f32.mxu0 %vm2427_vm0, %v2426_v4  ;;  %v2648_v21 = vmul.f32 0.0625, %v1504_v20 }
 0x488   :  { %2176 = vmatpush3.msra.mxu0 %v2628_v16 }
 0x489   :  { %v1326_v18 = vpop.xlane.xlu0 %1325  ;;  %2178 = vmatmul.mubr.msk.f32.vlgmr.msra.gmra.mrb[10].mxu0 %vm113_vm1, %v590_v11  ;;  %2185 = vmatprep.subr.mxu0 %v2426_v4  ;;  %v1860_v24 = vpop.xlane.xlu1 %1859 }
 0x48a   :  { %v2637_v19 = vmul.f32 0.0625, %v1326_v18  ;;  %2186 = vmatpush3.msra.mxu0 %v2632_v17  ;;  %2187 = vmatprep.mubr.msk.f32.mxu0 %vm2427_vm0, %v2426_v4  ;;  %v2662_v25 = vmul.f32 0.0625, %v1860_v24 }
 0x48b   :  { %2195 = vmatprep.subr.mxu0 %v2426_v4 }
 0x48d   :  { %2188 = vmatmul.mubr.msk.f32.vlgmr.msra.gmra.mrb[12].mxu0 %vm113_vm1, %v590_v11  ;;  %v1682_v22 = vpop.xlane.xlu0 %1681  ;;  %v2670_v26 = vpop.permute.xlu1 %675 }
 0x48e   :  { %2196 = vmatpush3.msra.mxu0 %v2637_v19  ;;  %2197 = vmatprep.mubr.msk.f32.mxu0 %vm2427_vm0, %v2426_v4  ;;  %v2655_v23 = vmul.f32 0.0625, %v1682_v22 }
 0x48f   :  { %2205 = vmatprep.subr.mxu0 %v2426_v4 }
 0x491   :  { %2198 = vmatmul.mubr.msk.f32.vlgmr.msra.gmra.mrb[14].mxu0 %vm113_vm1, %v590_v11  ;;  %v2672_v27 = vpop.permute.xlu0 %599  ;;  %v2675_v31 = vpop.permute.xlu1 %679 }
 0x492   :  { %2206 = vmatpush3.msra.mxu0 %v2648_v21  ;;  %2207 = vmatprep.mubr.msk.f32.mxu0 %vm2427_vm0, %v2426_v4 }
 0x493   :  { %2215 = vmatprep.subr.mxu0 %v2426_v4 }
 0x495   :  { %2208 = vmatmul.mubr.msk.f32.vlgmr.msra.gmra.mrb[16].mxu0 %vm113_vm1, %v590_v11  ;;  %v685_v24 = vpop.permute.xlu0 %684 }
 0x496   :  { %2216 = vmatpush3.msra.mxu0 %v2655_v23  ;;  %2217 = vmatprep.mubr.msk.f32.mxu0 %vm2427_vm0, %v2426_v4 }
 0x497   :  { %2225 = vmatprep.subr.mxu0 %v2426_v4 }
 0x499   :  { %2218 = vmatmul.mubr.msk.f32.vlgmr.msra.gmra.mrb[18].mxu0 %vm113_vm1, %v590_v11 }
 0x49a   :  { %2226 = vmatpush3.msra.mxu0 %v2662_v25  ;;  %2227 = vmatprep.mubr.msk.f32.mxu0 %vm2427_vm0, %v2426_v4 }
 0x49d   :  { %2228 = vmatmul.mubr.msk.f32.vlgmr.msra.gmra.mrb[20].mxu0 %vm113_vm1, %v590_v11 }
 0x514   :  { %v671_v28 = vpop.f32.mrb[6].mxu0 }
 0x515   :  { %v672_v29 = vadd.f32 %v671_v28, %v2672_v27  ;;  %v2159_v30 = vpop.f32.mrb[7].mxu0 }
 0x517   :  { %v678_v32 = vmul.f32 %v2670_v26, %v672_v29 }
 0x519   :  { %v682_v33 = vadd.f32 %v2675_v31, %v678_v32 }
 0x51b   :  { %v683_v34 = vmax.f32 %v682_v33, 0.0 }
 0x51d   :  { %2161 = vmatpush3.msra.mxu1 %v683_v34 }
 0x51e   :  { %2163 = vmatmul.mubr.msk.f32.vlgmr.msra.gmra.mrb[6].mxu1 %vm113_vm1, %v2682_v35  ;;  %2170 = vmatprep.subr.mxu1 %v2426_v4 }
 0x51f   :  { %2172 = vmatprep.mubr.msk.f32.mxu1 %vm2427_vm0, %v2426_v4 }
 0x558   :  { %v860_v3 = vpop.f32.mrb[8].mxu0 }
 0x559   :  { %v861_v36 = vadd.f32 %v860_v3, %v2672_v27  ;;  %v2169_v37 = vpop.f32.mrb[9].mxu0 }
 0x55b   :  { %v864_v38 = vmul.f32 %v861_v36, %v2670_v26 }
 0x55c   :  { %v1038_v39 = vpop.f32.mrb[10].mxu0 }
 0x55d   :  { %v865_v40 = vadd.f32 %v864_v38, %v2675_v31  ;;  %v1039_v41 = vadd.f32 %v1038_v39, %v2672_v27  ;;  %v2179_v42 = vpop.f32.mrb[11].mxu0 }
 0x55f   :  { %v866_v43 = vmax.f32 %v865_v40, 0.0  ;;  %v1042_v44 = vmul.f32 %v1039_v41, %v2670_v26 }
 0x560   :  { %v1216_v45 = vpop.f32.mrb[12].mxu0 }
 0x561   :  { %v1043_v46 = vadd.f32 %v1042_v44, %v2675_v31  ;;  %v1217_v47 = vadd.f32 %v1216_v45, %v2672_v27  ;;  %2171 = vmatpush3.msra.mxu1 %v866_v43  ;;  %v2189_v48 = vpop.f32.mrb[13].mxu0 }
 0x562   :  { %2173 = vmatmul.mubr.msk.f32.vlgmr.msra.gmra.mrb[8].mxu1 %vm113_vm1, %v2682_v35  ;;  %2180 = vmatprep.subr.mxu1 %v2426_v4 }
 0x563   :  { %v1044_v49 = vmax.f32 %v1043_v46, 0.0  ;;  %v1220_v50 = vmul.f32 %v1217_v47, %v2670_v26  ;;  %2182 = vmatprep.mubr.msk.f32.mxu1 %vm2427_vm0, %v2426_v4 }
 0x564   :  { %v1394_v51 = vpop.f32.mrb[14].mxu0 }
 0x565   :  { %v1221_v52 = vadd.f32 %v1220_v50, %v2675_v31  ;;  %v1395_v54 = vadd.f32 %v1394_v51, %v2672_v27  ;;  %2181 = vmatpush3.msra.mxu1 %v1044_v49  ;;  %v2199_v55 = vpop.f32.mrb[15].mxu0 }
 0x566   :  { %2183 = vmatmul.mubr.msk.f32.vlgmr.msra.gmra.mrb[10].mxu1 %vm113_vm1, %v2682_v35  ;;  %2190 = vmatprep.subr.mxu1 %v2426_v4 }
 0x567   :  { %v1222_v56 = vmax.f32 %v1221_v52, 0.0  ;;  %v1398_v57 = vmul.f32 %v1395_v54, %v2670_v26  ;;  %2192 = vmatprep.mubr.msk.f32.mxu1 %vm2427_vm0, %v2426_v4 }
 0x568   :  { %v1572_v58 = vpop.f32.mrb[16].mxu0 }
 0x569   :  { %v1399_v59 = vadd.f32 %v1398_v57, %v2675_v31  ;;  %v1573_v60 = vadd.f32 %v1572_v58, %v2672_v27  ;;  %2191 = vmatpush3.msra.mxu1 %v1222_v56  ;;  %v2209_v61 = vpop.f32.mrb[17].mxu0 }
 0x56a   :  { %2193 = vmatmul.mubr.msk.f32.vlgmr.msra.gmra.mrb[12].mxu1 %vm113_vm1, %v2682_v35  ;;  %2200 = vmatprep.subr.mxu1 %v2426_v4 }
 0x56b   :  { %v1400_v62 = vmax.f32 %v1399_v59, 0.0  ;;  %v1576_v63 = vmul.f32 %v1573_v60, %v2670_v26  ;;  %2202 = vmatprep.mubr.msk.f32.mxu1 %vm2427_vm0, %v2426_v4 }
 0x56c   :  { %v1750_v0 = vpop.f32.mrb[18].mxu0 }
 0x56d   :  { %v1577_v1 = vadd.f32 %v1576_v63, %v2675_v31  ;;  %v1751_v2 = vadd.f32 %v1750_v0, %v2672_v27  ;;  %2201 = vmatpush3.msra.mxu1 %v1400_v62  ;;  %v2219_v5 = vpop.f32.mrb[19].mxu0 }
 0x56e   :  { %2203 = vmatmul.mubr.msk.f32.vlgmr.msra.gmra.mrb[14].mxu1 %vm113_vm1, %v2682_v35  ;;  %2210 = vmatprep.subr.mxu1 %v2426_v4 }
 0x56f   :  { %v1578_v7 = vmax.f32 %v1577_v1, 0.0  ;;  %v1754_v8 = vmul.f32 %v1751_v2, %v2670_v26  ;;  %2212 = vmatprep.mubr.msk.f32.mxu1 %vm2427_vm0, %v2426_v4 }
 0x570   :  { %v1928_v9 = vpop.f32.mrb[20].mxu0 }
 0x571   :  { %v1755_v11 = vadd.f32 %v1754_v8, %v2675_v31  ;;  %v1929_v12 = vadd.f32 %v1928_v9, %v2672_v27  ;;  %2211 = vmatpush3.msra.mxu1 %v1578_v7  ;;  %v2229_v14 = vpop.f32.mrb[21].mxu0 }
 0x572   :  { %2213 = vmatmul.mubr.msk.f32.vlgmr.msra.gmra.mrb[16].mxu1 %vm113_vm1, %v2682_v35  ;;  %2220 = vmatprep.subr.mxu1 %v2426_v4 }
 0x573   :  { %v1756_v15 = vmax.f32 %v1755_v11, 0.0  ;;  %v1932_v18 = vmul.f32 %v1929_v12, %v2670_v26  ;;  %2222 = vmatprep.mubr.msk.f32.mxu1 %vm2427_vm0, %v2426_v4 }
 0x575   :  { %v1933_v20 = vadd.f32 %v1932_v18, %v2675_v31  ;;  %2221 = vmatpush3.msra.mxu1 %v1756_v15 }
 0x576   :  { %2223 = vmatmul.mubr.msk.f32.vlgmr.msra.gmra.mrb[18].mxu1 %vm113_vm1, %v2682_v35  ;;  %2230 = vmatprep.subr.mxu1 %v2426_v4 }
 0x577   :  { %v1934_v22 = vmax.f32 %v1933_v20, 0.0  ;;  %2232 = vmatprep.mubr.msk.f32.mxu1 %vm2427_vm0, %v2426_v4 }
 0x579   :  { %2231 = vmatpush3.msra.mxu1 %v1934_v22 }
 0x57a   :  { %2233 = vmatmul.mubr.msk.f32.vlgmr.msra.gmra.mrb[20].mxu1 %vm113_vm1, %v2682_v35 }
 0x5f1   :  { %v756_v26 = vpop.f32.mrb[6].mxu1 }
 0x5f2   :  { %v757_v27 = vadd.f32 %v756_v26, %v685_v24  ;;  %v2164_v28 = vpop.f32.mrb[7].mxu1 }
 0x5f4   :  { %v2059_v29 = vmul.f32 -1.442695, %v757_v27 }
 0x5f6   :  { %2268 = vpow2.f32 %v2059_v29 }
 0x600   :  { %v2269_v30 = vpop.eup %2268 }
 0x601   :  { %v763_v31 = vadd.f32 1.0, %v2269_v30 }
 0x603   :  { %2270 = vrcp.f32 %v763_v31 }
 0x60d   :  { %v2271_v32 = vpop.eup %2270 }
 0x60e   :  { %v766_v33 = vmul.f32 %v2271_v32, %v2616_v10 }
 0x610   :  { %776 = vperm.xlu0 %2266, %v766_v33   ;;  %v767_v34 = vsub.f32 0.0, %v766_v33 }
 0x612   :  { %770 = vperm.xlu1 %2267, %v767_v34  }
 0x635   :  { %v933_v4 = vpop.f32.mrb[8].mxu1 }
 0x636   :  { %v934_v3 = vadd.f32 %v933_v4, %v685_v24  ;;  %v2174_v36 = vpop.f32.mrb[9].mxu1 }
 0x638   :  { %v2062_v37 = vmul.f32 -1.442695, %v934_v3 }
 0x639   :  { %v1111_v35 = vpop.f32.mrb[10].mxu1 }
 0x63a   :  { %2272 = vpow2.f32 %v2062_v37  ;;  %v1112_v38 = vadd.f32 %v1111_v35, %v685_v24  ;;  %v2184_v39 = vpop.f32.mrb[11].mxu1 }
 0x63c   :  { %v2065_v40 = vmul.f32 -1.442695, %v1112_v38 }
 0x63d   :  { %v1289_v41 = vpop.f32.mrb[12].mxu1 }
 0x63e   :  { %2274 = vpow2.f32 %v2065_v40  ;;  %v1290_v42 = vadd.f32 %v1289_v41, %v685_v24  ;;  %v2194_v43 = vpop.f32.mrb[13].mxu1 }
 0x640   :  { %v2068_v44 = vmul.f32 -1.442695, %v1290_v42 }
 0x641   :  { %v1467_v45 = vpop.f32.mrb[14].mxu1 }
 0x642   :  { %2276 = vpow2.f32 %v2068_v44  ;;  %v1468_v10 = vadd.f32 %v1467_v45, %v685_v24  ;;  %v2204_v46 = vpop.f32.mrb[15].mxu1 }
 0x644   :  { %v2273_v47 = vpop.eup %2272  ;;  %v2071_v48 = vmul.f32 -1.442695, %v1468_v10 }
 0x645   :  { %v940_v49 = vadd.f32 1.0, %v2273_v47  ;;  %v1645_v50 = vpop.f32.mrb[16].mxu1 }
 0x646   :  { %2278 = vpow2.f32 %v2071_v48  ;;  %v1646_v51 = vadd.f32 %v1645_v50, %v685_v24  ;;  %v2214_v52 = vpop.f32.mrb[17].mxu1 }
 0x647   :  { %2280 = vrcp.f32 %v940_v49 }
 0x648   :  { %v2275_v54 = vpop.eup %2274  ;;  %v2074_v55 = vmul.f32 -1.442695, %v1646_v51 }
 0x649   :  { %v1118_v56 = vadd.f32 1.0, %v2275_v54  ;;  %v1823_v57 = vpop.f32.mrb[18].mxu1 }
 0x64a   :  { %2282 = vpow2.f32 %v2074_v55  ;;  %v1824_v58 = vadd.f32 %v1823_v57, %v685_v24  ;;  %v2224_v59 = vpop.f32.mrb[19].mxu1 }
 0x64b   :  { %2284 = vrcp.f32 %v1118_v56 }
 0x64c   :  { %v2277_v60 = vpop.eup %2276  ;;  %v2077_v61 = vmul.f32 -1.442695, %v1824_v58 }
 0x64d   :  { %v1296_v62 = vadd.f32 1.0, %v2277_v60  ;;  %v2001_v63 = vpop.f32.mrb[20].mxu1 }
 0x64e   :  { %2286 = vpow2.f32 %v2077_v61  ;;  %v2002_v0 = vadd.f32 %v2001_v63, %v685_v24  ;;  %v2234_v1 = vpop.f32.mrb[21].mxu1 }
 0x64f   :  { %2288 = vrcp.f32 %v1296_v62 }
 0x650   :  { %v2279_v2 = vpop.eup %2278  ;;  %v2080_v5 = vmul.f32 -1.442695, %v2002_v0 }
 0x651   :  { %v2281_v7 = vpop.eup %2280  ;;  %v1474_v8 = vadd.f32 1.0, %v2279_v2 }
 0x652   :  { %2290 = vpow2.f32 %v2080_v5  ;;  %v943_v9 = vmul.f32 %v2281_v7, %v2623_v13 }
 0x653   :  { %2292 = vrcp.f32 %v1474_v8 }
 0x654   :  { %v2283_v11 = vpop.eup %2282  ;;  %953 = vperm.xlu1 %2267, %v943_v9   ;;  %v944_v15 = vsub.f32 0.0, %v943_v9 }
 0x655   :  { %v2285_v12 = vpop.eup %2284  ;;  %v1652_v14 = vadd.f32 1.0, %v2283_v11 }
 0x656   :  { %v1121_v18 = vmul.f32 %v2285_v12, %v2628_v16 }
 0x657   :  { %2294 = vrcp.f32 %v1652_v14 }
 0x658   :  { %v2287_v20 = vpop.eup %2286  ;;  %947 = vperm.xlu1 %2267, %v944_v15   ;;  %v1122_v22 = vsub.f32 0.0, %v1121_v18 }
 0x659   :  { %v2289_v24 = vpop.eup %2288  ;;  %v1830_v26 = vadd.f32 1.0, %v2287_v20 }
 0x65a   :  { %1125 = vperm.xlu0 %2266, %v1122_v22   ;;  %v1299_v27 = vmul.f32 %v2289_v24, %v2632_v17 }
 0x65b   :  { %2296 = vrcp.f32 %v1830_v26 }
 0x65c   :  { %v2291_v28 = vpop.eup %2290  ;;  %1131 = vperm.xlu1 %2267, %v1121_v18   ;;  %v1300_v13 = vsub.f32 0.0, %v1299_v27 }
 0x65d   :  { %v2293_v29 = vpop.eup %2292  ;;  %v2008_v30 = vadd.f32 1.0, %v2291_v28 }
 0x65e   :  { %1303 = vperm.xlu0 %2266, %v1300_v13   ;;  %v1477_v31 = vmul.f32 %v2293_v29, %v2637_v19 }
 0x65f   :  { %2298 = vrcp.f32 %v2008_v30 }
 0x660   :  { %1309 = vperm.xlu1 %2267, %v1299_v27   ;;  %v1478_v16 = vsub.f32 0.0, %v1477_v31 }
 0x661   :  { %v2295_v32 = vpop.eup %2294 }
 0x662   :  { %1481 = vperm.xlu0 %2266, %v1478_v16   ;;  %v1655_v33 = vmul.f32 %v2295_v32, %v2648_v21 }
 0x664   :  { %1487 = vperm.xlu1 %2267, %v1477_v31   ;;  %v1656_v34 = vsub.f32 0.0, %v1655_v33 }
 0x665   :  { %v2297_v4 = vpop.eup %2296 }
 0x666   :  { %1659 = vperm.xlu0 %2266, %v1656_v34   ;;  %v1833_v17 = vmul.f32 %v2297_v4, %v2655_v23 }
 0x668   :  { %1665 = vperm.xlu1 %2267, %v1655_v33   ;;  %v1834_v3 = vsub.f32 0.0, %v1833_v17 }
 0x669   :  { %v2299_v36 = vpop.eup %2298 }
 0x66a   :  { %1837 = vperm.xlu0 %2266, %v1834_v3   ;;  %v2011_v37 = vmul.f32 %v2299_v36, %v2662_v25 }
 0x66c   :  { %1843 = vperm.xlu1 %2267, %v1833_v17   ;;  %v2012_v19 = vsub.f32 0.0, %v2011_v37 }
 0x66e   :  { %2015 = vperm.xlu0 %2266, %v2012_v19  }
 0x670   :  { %2021 = vperm.xlu1 %2267, %v2011_v37  }
 0x68f   :  { %v777_v21 = vpop.permute.xlu0 %776 }
 0x691   :  { %v771_v35 = vpop.permute.xlu1 %770 }
 0x692   :  { %v773_v38 = vmax.f32 %v771_v35, %v2602_v53 }
 0x694   :  { %v779_v39 = vmin.f32 %v777_v21, %v773_v38 }
 0x696   :  { %v780_v40 = vsub.f32 %v2602_v53, %v779_v39 }
 0x698   :  { %v782_v41 = vadd.f32 %v780_v40, %v2551_v6 }
 0x69a   :  { %783 = vst.msk [vmem:[#allocation11] sm:$0xff] %vm594_vm2, %v782_v41 }
 0x6d3   :  { %v954_v23 = vpop.permute.xlu1 %953 }
 0x6d7   :  { %v948_v42 = vpop.permute.xlu1 %947 }
 0x6d8   :  { %v950_v43 = vmax.f32 %v948_v42, %v2602_v53 }
 0x6d9   :  { %v1126_v25 = vpop.permute.xlu0 %1125 }
 0x6da   :  { %v956_v44 = vmin.f32 %v954_v23, %v950_v43  ;;  %v1128_v45 = vmax.f32 %v1126_v25, %v2602_v53 }
 0x6db   :  { %v1132_v10 = vpop.permute.xlu1 %1131 }
 0x6dc   :  { %v957_v46 = vsub.f32 %v2602_v53, %v956_v44  ;;  %v1134_v47 = vmin.f32 %v1132_v10, %v1128_v45 }
 0x6dd   :  { %v1304_v48 = vpop.permute.xlu0 %1303 }
 0x6de   :  { %v959_v49 = vadd.f32 %v957_v46, %v2551_v6  ;;  %v1135_v50 = vsub.f32 %v2602_v53, %v1134_v47  ;;  %v1306_v51 = vmax.f32 %v1304_v48, %v2602_v53 }
 0x6df   :  { %v1310_v52 = vpop.permute.xlu1 %1309 }
 0x6e0   :  { %961 = vst.msk [vmem:[#allocation11] sm:$0xff] %vm960_vm3, %v959_v49  ;;  %v1137_v54 = vadd.f32 %v1135_v50, %v2551_v6  ;;  %v1312_v55 = vmin.f32 %v1310_v52, %v1306_v51 }
 0x6e1   :  { %v1482_v56 = vpop.permute.xlu0 %1481 }
 0x6e2   :  { %1139 = vst.msk [vmem:[#allocation11] sm:$0xff] %vm1138_vm4, %v1137_v54  ;;  %v1313_v57 = vsub.f32 %v2602_v53, %v1312_v55  ;;  %v1484_v58 = vmax.f32 %v1482_v56, %v2602_v53 }
 0x6e3   :  { %v1488_v59 = vpop.permute.xlu1 %1487 }
 0x6e4   :  { %v1315_v60 = vadd.f32 %v1313_v57, %v2551_v6  ;;  %v1490_v61 = vmin.f32 %v1488_v59, %v1484_v58 }
 0x6e5   :  { %v1660_v62 = vpop.permute.xlu0 %1659 }
 0x6e6   :  { %1317 = vst.msk [vmem:[#allocation11] sm:$0xff] %vm1316_vm5, %v1315_v60  ;;  %v1491_v63 = vsub.f32 %v2602_v53, %v1490_v61  ;;  %v1662_v0 = vmax.f32 %v1660_v62, %v2602_v53 }
 0x6e7   :  { %v1666_v1 = vpop.permute.xlu1 %1665 }
 0x6e8   :  { %v1493_v2 = vadd.f32 %v1491_v63, %v2551_v6  ;;  %v1668_v5 = vmin.f32 %v1666_v1, %v1662_v0 }
 0x6e9   :  { %v1838_v7 = vpop.permute.xlu0 %1837 }
 0x6ea   :  { %1495 = vst.msk [vmem:[#allocation11] sm:$0xff] %vm1494_vm6, %v1493_v2  ;;  %v1669_v8 = vsub.f32 %v2602_v53, %v1668_v5  ;;  %v1840_v9 = vmax.f32 %v1838_v7, %v2602_v53 }
 0x6eb   :  { %v1844_v11 = vpop.permute.xlu1 %1843 }
 0x6ec   :  { %v1671_v12 = vadd.f32 %v1669_v8, %v2551_v6  ;;  %v1846_v14 = vmin.f32 %v1844_v11, %v1840_v9 }
 0x6ed   :  { %v2016_v15 = vpop.permute.xlu0 %2015 }
 0x6ee   :  { %v1847_v18 = vsub.f32 %v2602_v53, %v1846_v14  ;;  %v2018_v20 = vmax.f32 %v2016_v15, %v2602_v53  ;;  %1673 = vst.msk [vmem:[#allocation11] sm:$0xff] %vm1672_vm7, %v1671_v12 }
 0x6ef   :  { %v2022_v22 = vpop.permute.xlu1 %2021 }
 0x6f0   :  { %v1849_v24 = vadd.f32 %v1847_v18, %v2551_v6  ;;  %v2024_v26 = vmin.f32 %v2022_v22, %v2018_v20 }
 0x6f2   :  { %v2025_v27 = vsub.f32 %v2602_v53, %v2024_v26  ;;  %1851 = vst.msk [vmem:[#allocation11] sm:$0xff] %vm1850_vm8, %v1849_v24 }
 0x6f4   :  { %v2027_v28 = vadd.f32 %v2025_v27, %v2551_v6 }
 0x6f6   :  { %2029 = vst.msk [vmem:[#allocation11] sm:$0xff] %vm2028_vm9, %v2027_v28 }
 0x6f7   :  { %2399 = shalt.err (!%p2396_p8)
}
 0x6f8   :  { %s2400_s1 = scalar_lea.hbm %s2795_s8, 128 }
 0x6f9   :  { %p2401_p9 = scmp.ne.s32.totalorder %s2795_s8, %s2400_s1  ;;  %p2404_p10 = scmp.lt.u32.totalorder %s2400_s1, %s2795_s8 }
 0x6fb   :  { %p2406_p11 = pnand %p2404_p10, %p2401_p9 }
 0x6fd   :  { %2409 = shalt.err (!%p2406_p11)
}
 0x6fe   :  { %2039 = dma.vmem_to_hbm [thread:$0]  %s2037_s3, 128, %s2795_s8, [#allocation5]  }
 0x6ff   :  { %2416 = dma.done.wait [#allocation5], 128  }
 0x700   :  { %2417 = vsyncadd [#allocation5], 4294967168 }
 0x701   :  { %2043 = vsyncpa [#allocation4], 1 }
 0x702   :  { %2044 = vsyncpa [#allocation7], 1 }
 0x703   :  { %2045 = vsyncpa [#allocation10], 1 }
 0x704   :  { %2046 = vsyncpa [#allocation5], 1 }

</bundles_post_ra>
